<compile_context>
chip_gen: v7x
topology: tpu7x:2x2x1
jax: 0.10.0
libtpu: 0.0.40
codegen_flags: <defaults>
</compile_context>

<pallas_src>
import functools

import jax
import jax.numpy as jnp
from jax.experimental import pallas as pl
from jax.experimental.pallas import tpu as pltpu


def _cdiv(a, b):
    return (a + b - 1) // b


def _round_up(x, m):
    return (x + m - 1) // m * m


def _mlp_kernel(x_ref, w1_ref, b1_ref, w2_ref, b2_ref, w3_ref, b3_ref, o_ref):
    """Fused 385 -> 128 -> 128 -> 1 MLP for one batch tile.

    x_ref : (bt, in)  float32 (or bf16)  -- cast to bf16 here, right before the MXU
    w*    : bfloat16 weights (in, hid), (hid, hid), (hid, 1)
    b*    : float32 biases   (1, hid),  (1, hid),  (1, 1)
    o_ref : (bt, 1)   float32
    """
    x = x_ref[...].astype(jnp.bfloat16)
    # fc1 + ReLU  (bf16 operands, f32 accumulation; K=385 is handled by Mosaic's
    # internal vreg padding -- no HBM-side padding needed).
    h = jnp.dot(x, w1_ref[...], preferred_element_type=jnp.float32)
    h = jnp.maximum(h + b1_ref[...], 0.0)
    # Dropout(p=0.2) is identity at inference time (module.eval()) -> no-op here.
    # fc2 + ReLU
    h = jnp.dot(h.astype(jnp.bfloat16), w2_ref[...], preferred_element_type=jnp.float32)
    h = jnp.maximum(h + b2_ref[...], 0.0)
    # fc3: plain (bt, hid) @ (hid, 1) -> (bt, 1).  No transposes (v5e-friendly);
    # the narrow (1-lane) store is ~0.3% of the x traffic and hides under the DMA.
    y = jnp.dot(h.astype(jnp.bfloat16), w3_ref[...], preferred_element_type=jnp.float32)
    o_ref[...] = (y + b3_ref[...]).astype(o_ref.dtype)


def _pick_batch_tile(B, requested):
    """Static (trace-time) batch tile selection.

    - clamp to the batch so small batches never DMA/compute padded rows
    - keep >= 2 grid steps for B > 512 so ("parallel",) feeds both v7x TensorCores
    - fall back to a single full-extent block when the tile would overrun the batch
      (a full-extent block is always a legal block shape, aligned or not)
    """
    bt = min(requested, _round_up(B, 256))
    if B > 512 and _cdiv(B, bt) < 2:
        bt = _round_up(_cdiv(B, 2), 256)
    if bt >= B:
        return B
    return bt


@functools.partial(jax.jit, static_argnames=("batch_tile",))
def regression_net_forward(x, params, *, batch_tile=2048):
    """Forward pass of RegressionNet via one fused Pallas kernel.

    x: (B, input_size) float32 (bf16 also accepted)
    params: prepared params (see prepare_params): w1 (in, hid) bf16, b1 (1, hid) f32,
            w2 (hid, hid) bf16, b2 (1, hid) f32, w3 (hid, 1) bf16, b3 (1, 1) f32.
            Weights are stored (in_features, out_features), i.e. PyTorch weight.T.
    returns: (B, 1) float32
    """
    assert batch_tile % 8 == 0 and batch_tile >= 8
    B, in_size = x.shape
    hid = params["w1"].shape[1]
    assert params["w1"].shape[0] == in_size

    bt = _pick_batch_tile(B, batch_tile)
    n_steps = _cdiv(B, bt)

    # Advisory cost estimate for XLA's scheduler.
    flops = 2 * n_steps * bt * (in_size * hid + hid * hid + hid)
    bytes_accessed = (B * in_size * x.dtype.itemsize          # x (read once, by the kernel)
                      + (in_size * hid + hid * hid + hid) * 2  # weights (bf16)
                      + (2 * hid + 1) * 4                      # biases (f32)
                      + B * 4)                                  # output (f32)

    full = lambda shape: pl.BlockSpec(shape, lambda i: (0, 0))

    out = pl.pallas_call(
        _mlp_kernel,
        out_shape=jax.ShapeDtypeStruct((B, 1), jnp.float32),
        grid_spec=pltpu.PrefetchScalarGridSpec(
            num_scalar_prefetch=0,
            grid=(n_steps,),
            in_specs=[
                pl.BlockSpec((bt, in_size), lambda i: (i, 0)),  # x tile (ragged edge OK)
                full((in_size, hid)),   # w1 (resident: constant block index)
                full((1, hid)),         # b1
                full((hid, hid)),       # w2
                full((1, hid)),         # b2
                full((hid, 1)),         # w3
                full((1, 1)),           # b3
            ],
            out_specs=pl.BlockSpec((bt, 1), lambda i: (i, 0)),
        ),
        compiler_params=pltpu.CompilerParams(
            dimension_semantics=("parallel",),      # shards grid steps across v7x TCs
            vmem_limit_bytes=32 * 1024 * 1024,      # bt=2048 fits; raise if bt > ~4096
        ),
        cost_estimate=pl.CostEstimate(
            flops=flops, transcendentals=0, bytes_accessed=bytes_accessed),
    )(x, params["w1"], params["b1"], params["w2"], params["b2"],
      params["w3"], params["b3"])
    return out


def prepare_params(params):
    """One-time parameter prep (call once, outside the per-step forward):
    bf16 weights for the MXU, f32 biases, 2-D bias layout."""
    return {
        "w1": params["w1"].astype(jnp.bfloat16),
        "b1": params["b1"].reshape(1, -1).astype(jnp.float32),
        "w2": params["w2"].astype(jnp.bfloat16),
        "b2": params["b2"].reshape(1, -1).astype(jnp.float32),
        "w3": params["w3"].astype(jnp.bfloat16),
        "b3": params["b3"].reshape(1, -1).astype(jnp.float32),
    }


def init_params(key, input_size=385, hidden_size=128, output_size=1):
    """Deterministic synthetic init (PyTorch-style uniform fan-in bounds), f32."""
    ks = jax.random.split(key, 6)

    def linear(kw, kb, fan_in, fan_out):
        bound = 1.0 / jnp.sqrt(fan_in)
        w = jax.random.uniform(kw, (fan_in, fan_out), jnp.float32, -bound, bound)
        b = jax.random.uniform(kb, (1, fan_out), jnp.float32, -bound, bound)
        return w, b

    w1, b1 = linear(ks[0], ks[1], input_size, hidden_size)
    w2, b2 = linear(ks[2], ks[3], hidden_size, hidden_size)
    w3, b3 = linear(ks[4], ks[5], hidden_size, output_size)
    return {"w1": w1, "b1": b1, "w2": w2, "b2": b2, "w3": w3, "b3": b3}


def _reference(x, p):
    h = jnp.maximum(x @ p["w1"] + p["b1"], 0.0)
    h = jnp.maximum(h @ p["w2"] + p["b2"], 0.0)
    return h @ p["w3"] + p["b3"]


if __name__ == "__main__":
    key = jax.random.PRNGKey(0)
    k_x, k_p = jax.random.split(key)

    # Shapes fixed by the module (input_size=385, hidden=128); small demo batch.
    input_size, hidden_size, batch = 385, 128, 300
    params_f32 = init_params(k_p, input_size, hidden_size)
    params = prepare_params(params_f32)          # one-time bf16/f32 prep
    x = jax.random.normal(k_x, (batch, input_size), jnp.float32)

    ref = _reference(x, params_f32)

    # Default tiling: tile clamps to the batch -> a single full-extent block, no padding.
    out = jax.block_until_ready(regression_net_forward(x, params))
    assert out.shape == (batch, 1), out.shape
    # bf16 weights/activations with f32 accumulation vs f32 reference: loose tolerance.
    assert jnp.allclose(out, ref, atol=5e-2, rtol=5e-2), float(jnp.max(jnp.abs(out - ref)))

    # Small explicit tile: exercises the multi-step grid and the ragged last block
    # (300 rows = 2 full 128-row tiles + a 44-row masked edge).
    out2 = jax.block_until_ready(regression_net_forward(x, params, batch_tile=128))
    assert out2.shape == (batch, 1), out2.shape
    assert jnp.allclose(out2, ref, atol=5e-2, rtol=5e-2), float(jnp.max(jnp.abs(out2 - ref)))

    print("KERNEL_OK")
</pallas_src>

<mosaic_0001>
module attributes {stable_mosaic.version = 11 : i64} {
  func.func @_mlp_kernel(%arg0: i32, %arg1: memref<300x385xf32, #tpu.memory_space<vmem>>, %arg2: memref<385x128xbf16, #tpu.memory_space<vmem>>, %arg3: memref<1x128xf32, #tpu.memory_space<vmem>>, %arg4: memref<128x128xbf16, #tpu.memory_space<vmem>>, %arg5: memref<1x128xf32, #tpu.memory_space<vmem>>, %arg6: memref<128x1xbf16, #tpu.memory_space<vmem>>, %arg7: memref<1x1xf32, #tpu.memory_space<vmem>>, %arg8: memref<300x1xf32, #tpu.memory_space<vmem>>) attributes {dimension_semantics = [#tpu.dimension_semantics<parallel>], iteration_bounds = array<i64: 1>, scalar_prefetch = 0 : i64, scratch_operands = 0 : i64, tpu.core_type = #tpu.core_type<tc>, window_params = [{transform_indices = @transform_0, window_bounds = array<i64: 300, 385>}, {pipeline_mode = #tpu.pipeline_mode<synchronous>, transform_indices = @transform_1, window_bounds = array<i64: 385, 128>}, {pipeline_mode = #tpu.pipeline_mode<synchronous>, transform_indices = @transform_2, window_bounds = array<i64: 1, 128>}, {pipeline_mode = #tpu.pipeline_mode<synchronous>, transform_indices = @transform_3, window_bounds = array<i64: 128, 128>}, {pipeline_mode = #tpu.pipeline_mode<synchronous>, transform_indices = @transform_4, window_bounds = array<i64: 1, 128>}, {pipeline_mode = #tpu.pipeline_mode<synchronous>, transform_indices = @transform_5, window_bounds = array<i64: 128, 1>}, {pipeline_mode = #tpu.pipeline_mode<synchronous>, transform_indices = @transform_6, window_bounds = array<i64: 1, 1>}, {transform_indices = @transform_7, window_bounds = array<i64: 300, 1>}]} {
    %c0 = arith.constant 0 : index
    %c0_0 = arith.constant 0 : index
    %0 = vector.load %arg1[%c0, %c0_0] : memref<300x385xf32, #tpu.memory_space<vmem>>, vector<300x385xf32>
    %1 = arith.truncf %0 : vector<300x385xf32> to vector<300x385xbf16>
    %c0_1 = arith.constant 0 : index
    %c0_2 = arith.constant 0 : index
    %2 = vector.load %arg2[%c0_1, %c0_2] : memref<385x128xbf16, #tpu.memory_space<vmem>>, vector<385x128xbf16>
    %cst = arith.constant dense<0.000000e+00> : vector<300x128xf32>
    %3 = tpu.matmul %1, %2, %cst {dimension_numbers = #tpu.dot_dimension_numbers<[1], [0], [0], [1], [0, 0, 1, 1], [], []>} : vector<300x385xbf16>, vector<385x128xbf16>, vector<300x128xf32> -> vector<300x128xf32>
    %c0_3 = arith.constant 0 : index
    %c0_4 = arith.constant 0 : index
    %4 = vector.load %arg3[%c0_3, %c0_4] : memref<1x128xf32, #tpu.memory_space<vmem>>, vector<1x128xf32>
    %5 = vector.broadcast %4 : vector<1x128xf32> to vector<300x128xf32>
    %6 = arith.addf %3, %5 : vector<300x128xf32>
    %cst_5 = arith.constant 0.000000e+00 : f32
    %7 = vector.broadcast %cst_5 : f32 to vector<300x128xf32>
    %8 = arith.maximumf %6, %7 : vector<300x128xf32>
    %9 = arith.truncf %8 : vector<300x128xf32> to vector<300x128xbf16>
    %c0_6 = arith.constant 0 : index
    %c0_7 = arith.constant 0 : index
    %10 = vector.load %arg4[%c0_6, %c0_7] : memref<128x128xbf16, #tpu.memory_space<vmem>>, vector<128x128xbf16>
    %cst_8 = arith.constant dense<0.000000e+00> : vector<300x128xf32>
    %11 = tpu.matmul %9, %10, %cst_8 {dimension_numbers = #tpu.dot_dimension_numbers<[1], [0], [0], [1], [0, 0, 1, 1], [], []>} : vector<300x128xbf16>, vector<128x128xbf16>, vector<300x128xf32> -> vector<300x128xf32>
    %c0_9 = arith.constant 0 : index
    %c0_10 = arith.constant 0 : index
    %12 = vector.load %arg5[%c0_9, %c0_10] : memref<1x128xf32, #tpu.memory_space<vmem>>, vector<1x128xf32>
    %13 = vector.broadcast %12 : vector<1x128xf32> to vector<300x128xf32>
    %14 = arith.addf %11, %13 : vector<300x128xf32>
    %cst_11 = arith.constant 0.000000e+00 : f32
    %15 = vector.broadcast %cst_11 : f32 to vector<300x128xf32>
    %16 = arith.maximumf %14, %15 : vector<300x128xf32>
    %17 = arith.truncf %16 : vector<300x128xf32> to vector<300x128xbf16>
    %c0_12 = arith.constant 0 : index
    %c0_13 = arith.constant 0 : index
    %18 = vector.load %arg6[%c0_12, %c0_13] : memref<128x1xbf16, #tpu.memory_space<vmem>>, vector<128x1xbf16>
    %cst_14 = arith.constant dense<0.000000e+00> : vector<300x1xf32>
    %19 = tpu.matmul %17, %18, %cst_14 {dimension_numbers = #tpu.dot_dimension_numbers<[1], [0], [0], [1], [0, 0, 1, 1], [], []>} : vector<300x128xbf16>, vector<128x1xbf16>, vector<300x1xf32> -> vector<300x1xf32>
    %c0_15 = arith.constant 0 : index
    %c0_16 = arith.constant 0 : index
    %20 = vector.load %arg7[%c0_15, %c0_16] : memref<1x1xf32, #tpu.memory_space<vmem>>, vector<1x1xf32>
    %21 = vector.broadcast %20 : vector<1x1xf32> to vector<300x1xf32>
    %22 = arith.addf %19, %21 : vector<300x1xf32>
    %c0_17 = arith.constant 0 : index
    %c0_18 = arith.constant 0 : index
    %23 = vector.load %arg8[%c0_17, %c0_18] : memref<300x1xf32, #tpu.memory_space<vmem>>, vector<300x1xf32>
    tpu.vector_store %arg8[%c0_17, %c0_18], %22 {strides = array<i32>} : memref<300x1xf32, #tpu.memory_space<vmem>>, vector<300x1xf32>,
    return
  }
  func.func @transform_0(%arg0: i32) -> (i32, i32) {
    %c0_i32 = arith.constant 0 : i32
    %c0_i32_0 = arith.constant 0 : i32
    return %arg0, %c0_i32 : i32, i32
  }
  func.func @transform_1(%arg0: i32) -> (i32, i32) {
    %c0_i32 = arith.constant 0 : i32
    %c0_i32_0 = arith.constant 0 : i32
    %c0_i32_1 = arith.constant 0 : i32
    return %c0_i32, %c0_i32_0 : i32, i32
  }
  func.func @transform_2(%arg0: i32) -> (i32, i32) {
    %c0_i32 = arith.constant 0 : i32
    %c0_i32_0 = arith.constant 0 : i32
    %c0_i32_1 = arith.constant 0 : i32
    return %c0_i32, %c0_i32_0 : i32, i32
  }
  func.func @transform_3(%arg0: i32) -> (i32, i32) {
    %c0_i32 = arith.constant 0 : i32
    %c0_i32_0 = arith.constant 0 : i32
    %c0_i32_1 = arith.constant 0 : i32
    return %c0_i32, %c0_i32_0 : i32, i32
  }
  func.func @transform_4(%arg0: i32) -> (i32, i32) {
    %c0_i32 = arith.constant 0 : i32
    %c0_i32_0 = arith.constant 0 : i32
    %c0_i32_1 = arith.constant 0 : i32
    return %c0_i32, %c0_i32_0 : i32, i32
  }
  func.func @transform_5(%arg0: i32) -> (i32, i32) {
    %c0_i32 = arith.constant 0 : i32
    %c0_i32_0 = arith.constant 0 : i32
    %c0_i32_1 = arith.constant 0 : i32
    return %c0_i32, %c0_i32_0 : i32, i32
  }
  func.func @transform_6(%arg0: i32) -> (i32, i32) {
    %c0_i32 = arith.constant 0 : i32
    %c0_i32_0 = arith.constant 0 : i32
    %c0_i32_1 = arith.constant 0 : i32
    return %c0_i32, %c0_i32_0 : i32, i32
  }
  func.func @transform_7(%arg0: i32) -> (i32, i32) {
    %c0_i32 = arith.constant 0 : i32
    %c0_i32_0 = arith.constant 0 : i32
    return %arg0, %c0_i32 : i32, i32
  }
}

</mosaic_0001>

<bundles_post_ra>
// kernel: regression_net_forward.1
= control target key start
LH: loop header
LB: loop body
LE: loop exit
PB: predicated region body
PF: predicated region fallthrough
CT: control target
= control target key end

     0   :  { %v2022_v0 = vmov 0   ;;  %vm518_vm0 = vcmask 1040384   ;;  %vm460_vm1 = vcmask 7168   ;;  %vm2024_vm2 = vmmov 0   ;;  %s3061_s1 = inlined_call_operand.vmem [shape: bf16[385,128], index: 1, kind: input, shape index: {}]   ;;  %s3062_s0 = inlined_call_operand.vmem [shape: f32[300,385], index: 0, kind: input, shape index: {}]   ;;  %s3063_s3 = inlined_call_operand.vmem [shape: bf16[128,128], index: 3, kind: input, shape index: {}]   ;;  %s3064_s5 = inlined_call_operand.vmem [shape: bf16[128,1], index: 5, kind: input, shape index: {}]   ;;  %s3065_s2 = inlined_call_operand.vmem [shape: f32[1,128], index: 2, kind: input, shape index: {}]   ;;  %s3066_s4 = inlined_call_operand.vmem [shape: f32[1,128], index: 4, kind: input, shape index: {}]   ;;  %s3067_s6 = inlined_call_operand.<no memory space> [shape: f32[1,1], index: 6, kind: input, shape index: {}]   ;;  %s3068_s7 = inlined_call_operand.vmem [shape: f32[300,1], index: 7, kind: output, shape index: {}]  }
   0x1   :  { %524 = vmatprep.subr.bf16.mxu0 %v2022_v0  ;;  %v1981_v1 = vld [vmem:[%s3061_s1] sm:$0xff]   ;;  %v1982_v2 = vld [vmem:[%s3061_s1 + $0x8] sm:$0xff]   ;;  %v1983_v3 = vld [vmem:[%s3061_s1 + $0x10] sm:$0xff]   ;;  %v520_v57 = vsel %vm518_vm0, 65535, %v2022_v0  ;;  %vm1557_vm3 = vcmask 3072  }
   0x2   :  { %525 = vmatpush1.bf16.msra.mxu0 %v1981_v1  ;;  %v1984_v4 = vld [vmem:[%s3061_s1 + $0x18] sm:$0xff]   ;;  %v1985_v5 = vld [vmem:[%s3061_s1 + $0x20] sm:$0xff]   ;;  %v30_v6 = vld [vmem:[%s3062_s0 + $0x8] sm:$0xff] }
   0x3   :  { %526 = vmatprep.subr.bf16.mxu0 %v2022_v0  ;;  %v34_v7 = vld [vmem:[%s3062_s0 + $0x28] sm:$0xff]  ;;  %v1987_v10 = vld [vmem:[%s3061_s1 + $0x30] sm:$0xff]   ;;  %v1988_v11 = vld [vmem:[%s3061_s1 + $0x38] sm:$0xff]  }
   0x4   :  { %v182_v8 = vpack.c.bf16 %v34_v7, %v30_v6  ;;  %v1986_v9 = vld [vmem:[%s3061_s1 + $0x28] sm:$0xff]   ;;  %v1989_v12 = vld [vmem:[%s3061_s1 + $0x40] sm:$0xff]   ;;  %v1991_v14 = vld [vmem:[%s3061_s1 + $0x50] sm:$0xff]  }
   0x5   :  { %v1990_v13 = vld [vmem:[%s3061_s1 + $0x48] sm:$0xff]   ;;  %v1992_v15 = vld [vmem:[%s3061_s1 + $0x58] sm:$0xff]   ;;  %v1993_v16 = vld [vmem:[%s3061_s1 + $0x60] sm:$0xff]  }
   0x6   :  { %527 = vmatpush1.bf16.msra.mxu0 %v1982_v2  ;;  %556 = vmatprep.mubr.bf16.mxu0 %v182_v8  ;;  %v1994_v17 = vld [vmem:[%s3061_s1 + $0x68] sm:$0xff]   ;;  %v1995_v18 = vld [vmem:[%s3061_s1 + $0x70] sm:$0xff]   ;;  %v1996_v19 = vld [vmem:[%s3061_s1 + $0x78] sm:$0xff]  }
   0x7   :  { %528 = vmatprep.subr.bf16.mxu0 %v2022_v0  ;;  %v29_v20 = vld [vmem:[%s3062_s0] sm:$0xff]  ;;  %v38_v22 = vld [vmem:[%s3062_s0 + $0x48] sm:$0xff]  ;;  %v1999_v34 = vld [vmem:[%s3061_s1 + $0x90] sm:$0xff]  }
   0x8   :  { %v33_v21 = vld [vmem:[%s3062_s0 + $0x20] sm:$0xff]  ;;  %v42_v23 = vld [vmem:[%s3062_s0 + $0x68] sm:$0xff]  ;;  %v2000_v37 = vld [vmem:[%s3061_s1 + $0x98] sm:$0xff]  }
   0x9   :  { %v181_v24 = vpack.c.bf16 %v33_v21, %v29_v20  ;;  %v1997_v25 = vld [vmem:[%s3061_s1 + $0x80] sm:$0xff]   ;;  %v186_v26 = vpack.c.bf16 %v42_v23, %v38_v22  ;;  %v1998_v29 = vld [vmem:[%s3061_s1 + $0x88] sm:$0xff]   ;;  %v2003_v50 = vld [vmem:[%s3061_s1 + $0xb0] sm:$0xff]  }
   0xa   :  { %529 = vmatpush1.bf16.msra.mxu0 %v1983_v3  ;;  %v37_v27 = vld [vmem:[%s3062_s0 + $0x40] sm:$0xff]  ;;  %v46_v30 = vld [vmem:[%s3062_s0 + $0x88] sm:$0xff]  ;;  %v2004_v53 = vld [vmem:[%s3061_s1 + $0xb8] sm:$0xff]  }
   0xb   :  { %530 = vmatprep.subr.bf16.mxu0 %v2022_v0  ;;  %v41_v28 = vld [vmem:[%s3062_s0 + $0x60] sm:$0xff]  ;;  %v50_v31 = vld [vmem:[%s3062_s0 + $0xa8] sm:$0xff] }
   0xc   :  { %v185_v32 = vpack.c.bf16 %v41_v28, %v37_v27  ;;  %v190_v33 = vpack.c.bf16 %v50_v31, %v46_v30  ;;  %v45_v35 = vld [vmem:[%s3062_s0 + $0x80] sm:$0xff]  ;;  %v54_v38 = vld [vmem:[%s3062_s0 + $0xc8] sm:$0xff] }
   0xd   :  { %v49_v36 = vld [vmem:[%s3062_s0 + $0xa0] sm:$0xff]  ;;  %v58_v39 = vld [vmem:[%s3062_s0 + $0xe8] sm:$0xff] }
   0xe   :  { %531 = vmatpush1.bf16.msra.mxu0 %v1984_v4  ;;  %v189_v40 = vpack.c.bf16 %v49_v36, %v45_v35  ;;  %v194_v41 = vpack.c.bf16 %v58_v39, %v54_v38  ;;  %v2001_v42 = vld [vmem:[%s3061_s1 + $0xa0] sm:$0xff]   ;;  %v2002_v45 = vld [vmem:[%s3061_s1 + $0xa8] sm:$0xff]  }
   0xf   :  { %532 = vmatprep.subr.bf16.mxu0 %v2022_v0  ;;  %v53_v43 = vld [vmem:[%s3062_s0 + $0xc0] sm:$0xff]  ;;  %v62_v46 = vld [vmem:[%s3062_s0 + $0x108] sm:$0xff] }
  0x10   :  { %v57_v44 = vld [vmem:[%s3062_s0 + $0xe0] sm:$0xff]  ;;  %v66_v47 = vld [vmem:[%s3062_s0 + $0x128] sm:$0xff] }
  0x11   :  { %v193_v48 = vpack.c.bf16 %v57_v44, %v53_v43  ;;  %v198_v49 = vpack.c.bf16 %v66_v47, %v62_v46  ;;  %v61_v51 = vld [vmem:[%s3062_s0 + $0x100] sm:$0xff]  ;;  %v70_v55 = vld [vmem:[%s3062_s0 + $0x148] sm:$0xff] }
  0x12   :  { %533 = vmatpush1.bf16.msra.mxu0 %v1985_v5  ;;  %v65_v52 = vld [vmem:[%s3062_s0 + $0x120] sm:$0xff]  ;;  %v74_v56 = vld [vmem:[%s3062_s0 + $0x168] sm:$0xff] }
  0x13   :  { %534 = vmatprep.subr.bf16.mxu0 %v2022_v0  ;;  %v2005_v54 = vld [vmem:[%s3061_s1 + $0xc0] ss:$0 sps:$4 sm:$0x11]   ;;  %v197_v58 = vpack.c.bf16 %v65_v52, %v61_v51  ;;  %v202_v59 = vpack.c.bf16 %v74_v56, %v70_v55  ;;  %v78_v63 = vld [vmem:[%s3062_s0 + $0x188] sm:$0xff] }
  0x14   :  { %v522_v60 = vand.u32 %v2005_v54, %v520_v57  ;;  %v69_v61 = vld [vmem:[%s3062_s0 + $0x140] sm:$0xff]  ;;  %v82_v1 = vld [vmem:[%s3062_s0 + $0x1a8] sm:$0xff] }
  0x15   :  { %v73_v62 = vld [vmem:[%s3062_s0 + $0x160] sm:$0xff]  ;;  %v206_v2 = vpack.c.bf16 %v82_v1, %v78_v63  ;;  %v86_v5 = vld [vmem:[%s3062_s0 + $0x1c8] sm:$0xff] }
  0x16   :  { %535 = vmatpush1.bf16.msra.mxu0 %v1986_v9  ;;  %v77_v3 = vld [vmem:[%s3062_s0 + $0x180] sm:$0xff]  ;;  %v90_v6 = vld [vmem:[%s3062_s0 + $0x1e8] sm:$0xff] }
  0x17   :  { %536 = vmatprep.subr.bf16.mxu0 %v2022_v0  ;;  %v81_v4 = vld [vmem:[%s3062_s0 + $0x1a0] sm:$0xff]  ;;  %v210_v8 = vpack.c.bf16 %v90_v6, %v86_v5  ;;  %v110_v23 = vld [vmem:[%s3062_s0 + $0x288] sm:$0xff] }
  0x18   :  { %v205_v7 = vpack.c.bf16 %v81_v4, %v77_v3  ;;  %v85_v9 = vld [vmem:[%s3062_s0 + $0x1c0] sm:$0xff]  ;;  %v122_v30 = vld [vmem:[%s3062_s0 + $0x2e8] sm:$0xff] }
  0x19   :  { %v101_v21 = vld [vmem:[%s3062_s0 + $0x240] sm:$0xff]  ;;  %v126_v35 = vld [vmem:[%s3062_s0 + $0x308] sm:$0xff] }
  0x1a   :  { %537 = vmatpush1.bf16.msra.mxu0 %v1987_v10  ;;  %v89_v10 = vld [vmem:[%s3062_s0 + $0x1e0] sm:$0xff]  ;;  %v130_v36 = vld [vmem:[%s3062_s0 + $0x328] sm:$0xff] }
  0x1b   :  { %538 = vmatprep.subr.bf16.mxu0 %v2022_v0  ;;  %v105_v22 = vld [vmem:[%s3062_s0 + $0x260] sm:$0xff]  ;;  %v230_v38 = vpack.c.bf16 %v130_v36, %v126_v35  ;;  %v142_v47 = vld [vmem:[%s3062_s0 + $0x388] sm:$0xff]  ;;  %v55_v35 = vld [vmem:[%s3062_s0 + $0xd0] sm:$0xff] }
  0x1c   :  { %v109_v27 = vld [vmem:[%s3062_s0 + $0x280] sm:$0xff]  ;;  %v154_v54 = vld [vmem:[%s3062_s0 + $0x3e8] sm:$0xff]  ;;  %v59_v36 = vld [vmem:[%s3062_s0 + $0xf0] sm:$0xff] }
  0x1d   :  { %v113_v28 = vld [vmem:[%s3062_s0 + $0x2a0] sm:$0xff] }
  0x1e   :  { %539 = vmatpush1.bf16.msra.mxu0 %v1988_v11  ;;  %v94_v11 = vld [vmem:[%s3062_s0 + $0x208] sm:$0xff]  ;;  %v221_v31 = vpack.c.bf16 %v113_v28, %v109_v27  ;;  %v125_v39 = vld [vmem:[%s3062_s0 + $0x300] sm:$0xff] }
  0x1f   :  { %540 = vmatprep.subr.bf16.mxu0 %v2022_v0  ;;  %v137_v46 = vld [vmem:[%s3062_s0 + $0x360] sm:$0xff] }
  0x20   :  { %v141_v51 = vld [vmem:[%s3062_s0 + $0x380] sm:$0xff] }
  0x21   :  { %v145_v52 = vld [vmem:[%s3062_s0 + $0x3a0] sm:$0xff] }
  0x22   :  { %541 = vmatpush1.bf16.msra.mxu0 %v1989_v12  ;;  %v98_v12 = vld [vmem:[%s3062_s0 + $0x228] sm:$0xff]  ;;  %v237_v55 = vpack.c.bf16 %v145_v52, %v141_v51  ;;  %v149_v57 = vld [vmem:[%s3062_s0 + $0x3c0] sm:$0xff] }
  0x23   :  { %542 = vmatprep.subr.bf16.mxu0 %v2022_v0  ;;  %v157_v63 = vld [vmem:[%s3062_s0 + $0x400] sm:$0xff] }
  0x24   :  { %v161_v1 = vld [vmem:[%s3062_s0 + $0x420] sm:$0xff] }
  0x25   :  { %v245_v3 = vpack.c.bf16 %v161_v1, %v157_v63  ;;  %v165_v5 = vld [vmem:[%s3062_s0 + $0x440] sm:$0xff]  ;;  %v92_v63 = vld [vmem:[%s3062_s0 + $0x1f8] sm:$0xff] }
  0x26   :  { %543 = vmatpush1.bf16.msra.mxu0 %v1990_v13  ;;  %v209_v13 = vpack.c.bf16 %v89_v10, %v85_v9  ;;  %v169_v6 = vld [vmem:[%s3062_s0 + $0x460] sm:$0xff] }
  0x27   :  { %544 = vmatprep.subr.bf16.mxu0 %v2022_v0  ;;  %v249_v9 = vpack.c.bf16 %v169_v6, %v165_v5  ;;  %v2010_v52 = vld [vmem:[%s3063_s3 + $0x20] sm:$0xff]   ;;  %v100_v5 = vld [vmem:[%s3062_s0 + $0x238] sm:$0xff] }
  0x2a   :  { %545 = vmatpush1.bf16.msra.mxu0 %v1991_v14  ;;  %v214_v14 = vpack.c.bf16 %v98_v12, %v94_v11  ;;  %v173_v11 = vld [vmem:[%s3062_s0 + $0x480] sm:$0xff] }
  0x2b   :  { %546 = vmatprep.subr.bf16.mxu0 %v2022_v0  ;;  %v177_v12 = vld [vmem:[%s3062_s0 + $0x4a0] sm:$0xf] }
  0x2e   :  { %547 = vmatpush1.bf16.msra.mxu0 %v1992_v15  ;;  %v93_v15 = vld [vmem:[%s3062_s0 + $0x200] sm:$0xff] }
  0x2f   :  { %548 = vmatprep.subr.bf16.mxu0 %v2022_v0 }
  0x32   :  { %549 = vmatpush1.bf16.msra.mxu0 %v1993_v16  ;;  %v97_v16 = vld [vmem:[%s3062_s0 + $0x220] sm:$0xff] }
  0x33   :  { %550 = vmatprep.subr.bf16.mxu0 %v2022_v0 }
  0x36   :  { %551 = vmatpush1.bf16.msra.mxu0 %v1994_v17  ;;  %v102_v17 = vld [vmem:[%s3062_s0 + $0x248] sm:$0xff] }
  0x37   :  { %552 = vmatprep.subr.bf16.mxu0 %v2022_v0 }
  0x3a   :  { %553 = vmatpush1.bf16.msra.mxu0 %v1995_v18  ;;  %v106_v18 = vld [vmem:[%s3062_s0 + $0x268] sm:$0xff] }
  0x3b   :  { %554 = vmatprep.subr.bf16.mxu0 %v2022_v0  ;;  %v218_v20 = vpack.c.bf16 %v106_v18, %v102_v17  ;;  %v31_v17 = vld [vmem:[%s3062_s0 + $0x10] sm:$0xff] }
  0x3c   :  { %v35_v18 = vld [vmem:[%s3062_s0 + $0x30] sm:$0xff] }
  0x3e   :  { %555 = vmatpush1.bf16.msra.mxu0 %v1996_v19  ;;  %v213_v19 = vpack.c.bf16 %v97_v16, %v93_v15  ;;  %v253_v15 = vpack.c.bf16 %v177_v12, %v173_v11  ;;  %v108_v11 = vld [vmem:[%s3062_s0 + $0x278] sm:$0xff] }
  0x3f   :  { %709 = vmatprep.subr.bf16.mxu0 %v2022_v0 }
  0x41   :  { %557 = vmatmul.mubr.bf16.vlgmr.msra.gmra.mrb[0].mxu0 %v181_v24  ;;  %v114_v24 = vld [vmem:[%s3062_s0 + $0x2a8] sm:$0xff] }
  0x42   :  { %710 = vmatpush1.bf16.msra.mxu0 %v1997_v25  ;;  %564 = vmatprep.mubr.bf16.mxu0 %v186_v26  ;;  %v217_v25 = vpack.c.bf16 %v105_v22, %v101_v21  ;;  %v222_v26 = vpack.c.bf16 %v114_v24, %v110_v23  ;;  %v183_v21 = vpack.c.bf16 %v35_v18, %v31_v17  ;;  %v39_v23 = vld [vmem:[%s3062_s0 + $0x50] sm:$0xff]  ;;  %v116_v17 = vld [vmem:[%s3062_s0 + $0x2b8] sm:$0xff] }
  0x43   :  { %711 = vmatprep.subr.bf16.mxu0 %v2022_v0  ;;  %v43_v24 = vld [vmem:[%s3062_s0 + $0x70] sm:$0xff] }
  0x44   :  { %v187_v27 = vpack.c.bf16 %v43_v24, %v39_v23  ;;  %v124_v23 = vld [vmem:[%s3062_s0 + $0x2f8] sm:$0xff] }
  0x46   :  { %712 = vmatpush1.bf16.msra.mxu0 %v1998_v29  ;;  %v118_v29 = vld [vmem:[%s3062_s0 + $0x2c8] sm:$0xff] }
  0x47   :  { %713 = vmatprep.subr.bf16.mxu0 %v2022_v0 }
  0x49   :  { %565 = vmatmul.mubr.bf16.gmra.mrb[4].mxu0 %v185_v32  ;;  %v226_v32 = vpack.c.bf16 %v122_v30, %v118_v29  ;;  %v47_v29 = vld [vmem:[%s3062_s0 + $0x90] sm:$0xff] }
  0x4a   :  { %572 = vmatprep.mubr.bf16.mxu0 %v190_v33  ;;  %714 = vmatpush1.bf16.msra.mxu0 %v1999_v34  ;;  %v117_v33 = vld [vmem:[%s3062_s0 + $0x2c0] sm:$0xff]  ;;  %v51_v30 = vld [vmem:[%s3062_s0 + $0xb0] sm:$0xff] }
  0x4b   :  { %715 = vmatprep.subr.bf16.mxu0 %v2022_v0  ;;  %v121_v34 = vld [vmem:[%s3062_s0 + $0x2e0] sm:$0xff] }
  0x4e   :  { %716 = vmatpush1.bf16.msra.mxu0 %v2000_v37  ;;  %v225_v37 = vpack.c.bf16 %v121_v34, %v117_v33  ;;  %v191_v33 = vpack.c.bf16 %v51_v30, %v47_v29  ;;  %v132_v29 = vld [vmem:[%s3062_s0 + $0x338] sm:$0xff]  ;;  %v2012_v30 = vld [vmem:[%s3063_s3 + $0x30] sm:$0xff]  }
  0x4f   :  { %717 = vmatprep.subr.bf16.mxu0 %v2022_v0 }
  0x51   :  { %573 = vmatmul.mubr.bf16.gmra.mrb[8].mxu0 %v189_v40  ;;  %v129_v40 = vld [vmem:[%s3062_s0 + $0x320] sm:$0xff] }
  0x52   :  { %580 = vmatprep.mubr.bf16.mxu0 %v194_v41  ;;  %718 = vmatpush1.bf16.msra.mxu0 %v2001_v42  ;;  %v134_v41 = vld [vmem:[%s3062_s0 + $0x348] sm:$0xff]  ;;  %v229_v43 = vpack.c.bf16 %v129_v40, %v125_v39  ;;  %v2006_v39 = vld [vmem:[%s3063_s3] sm:$0xff]   ;;  %v68_v40 = vld [vmem:[%s3062_s0 + $0x138] sm:$0xff] }
  0x53   :  { %719 = vmatprep.subr.bf16.mxu0 %v2022_v0  ;;  %v138_v42 = vld [vmem:[%s3062_s0 + $0x368] sm:$0xff] }
  0x54   :  { %v234_v44 = vpack.c.bf16 %v138_v42, %v134_v41  ;;  %v2007_v41 = vld [vmem:[%s3063_s3 + $0x8] sm:$0xff]   ;;  %v195_v42 = vpack.c.bf16 %v59_v36, %v55_v35  ;;  %v131_v35 = vld [vmem:[%s3062_s0 + $0x330] sm:$0xff]  ;;  %v136_v36 = vld [vmem:[%s3062_s0 + $0x358] sm:$0xff] }
  0x56   :  { %720 = vmatpush1.bf16.msra.mxu0 %v2002_v45  ;;  %v133_v45 = vld [vmem:[%s3062_s0 + $0x340] sm:$0xff] }
  0x57   :  { %721 = vmatprep.subr.bf16.mxu0 %v2022_v0 }
  0x59   :  { %581 = vmatmul.mubr.bf16.gmra.mrb[12].mxu0 %v193_v48  ;;  %v146_v48 = vld [vmem:[%s3062_s0 + $0x3a8] sm:$0xff] }
  0x5a   :  { %588 = vmatprep.mubr.bf16.mxu0 %v198_v49  ;;  %722 = vmatpush1.bf16.msra.mxu0 %v2003_v50  ;;  %v233_v49 = vpack.c.bf16 %v137_v46, %v133_v45  ;;  %v238_v50 = vpack.c.bf16 %v146_v48, %v142_v47  ;;  %v63_v45 = vld [vmem:[%s3062_s0 + $0x110] sm:$0xff]  ;;  %v72_v47 = vld [vmem:[%s3062_s0 + $0x158] sm:$0xff] }
  0x5b   :  { %723 = vmatprep.subr.bf16.mxu0 %v2022_v0  ;;  %v67_v46 = vld [vmem:[%s3062_s0 + $0x130] sm:$0xff]  ;;  %v76_v48 = vld [vmem:[%s3062_s0 + $0x178] sm:$0xff] }
  0x5c   :  { %v204_v51 = vpack.c.bf16 %v76_v48, %v72_v47  ;;  %v143_v47 = vld [vmem:[%s3062_s0 + $0x390] sm:$0xff] }
  0x5d   :  { %v147_v48 = vld [vmem:[%s3062_s0 + $0x3b0] sm:$0xff] }
  0x5e   :  { %724 = vmatpush1.bf16.msra.mxu0 %v2004_v53  ;;  %v150_v53 = vld [vmem:[%s3062_s0 + $0x3c8] sm:$0xff] }
  0x5f   :  { %725 = vmatprep.subr.bf16.mxu0 %v2022_v0  ;;  %v201_v0 = vpack.c.bf16 %v73_v62, %v69_v61  ;;  %v242_v56 = vpack.c.bf16 %v154_v54, %v150_v53  ;;  %v71_v53 = vld [vmem:[%s3062_s0 + $0x150] sm:$0xff] }
  0x60   :  { %v75_v54 = vld [vmem:[%s3062_s0 + $0x170] sm:$0xff] }
  0x61   :  { %589 = vmatmul.mubr.bf16.gmra.mrb[16].mxu0 %v197_v58  ;;  %v153_v58 = vld [vmem:[%s3062_s0 + $0x3e0] sm:$0xff] }
  0x62   :  { %596 = vmatprep.mubr.bf16.mxu0 %v202_v59  ;;  %726 = vmatpush1.bf16.msra.mxu0 %v522_v60  ;;  %v158_v59 = vld [vmem:[%s3062_s0 + $0x408] sm:$0xff]  ;;  %v241_v61 = vpack.c.bf16 %v153_v58, %v149_v57  ;;  %v203_v58 = vpack.c.bf16 %v75_v54, %v71_v53  ;;  %v151_v53 = vld [vmem:[%s3062_s0 + $0x3d0] sm:$0xff] }
  0x63   :  { %v162_v60 = vld [vmem:[%s3062_s0 + $0x428] sm:$0xff]  ;;  %v155_v54 = vld [vmem:[%s3062_s0 + $0x3f0] sm:$0xff] }
  0x64   :  { %v246_v62 = vpack.c.bf16 %v162_v60, %v158_v59  ;;  %v2011_v57 = vld [vmem:[%s3063_s3 + $0x28] sm:$0xff]   ;;  %v79_v60 = vld [vmem:[%s3062_s0 + $0x190] sm:$0xff] }
  0x69   :  { %597 = vmatmul.mubr.bf16.gmra.mrb[20].mxu0 %v201_v0  ;;  %v166_v0 = vld [vmem:[%s3062_s0 + $0x448] sm:$0xff] }
  0x6a   :  { %604 = vmatprep.mubr.bf16.mxu0 %v206_v2  ;;  %v170_v2 = vld [vmem:[%s3062_s0 + $0x468] sm:$0xff] }
  0x6b   :  { %v250_v4 = vpack.c.bf16 %v170_v2, %v166_v0  ;;  %v87_v2 = vld [vmem:[%s3062_s0 + $0x1d0] sm:$0xff] }
  0x71   :  { %605 = vmatmul.mubr.bf16.gmra.mrb[24].mxu0 %v205_v7  ;;  %v174_v7 = vld [vmem:[%s3062_s0 + $0x488] sm:$0xff] }
  0x72   :  { %612 = vmatprep.mubr.bf16.mxu0 %v210_v8  ;;  %v178_v8 = vld [vmem:[%s3062_s0 + $0x4a8] sm:$0xf] }
  0x73   :  { %v254_v10 = vpack.c.bf16 %v178_v8, %v174_v7  ;;  %v95_v8 = vld [vmem:[%s3062_s0 + $0x210] sm:$0xff] }
  0x79   :  { %613 = vmatmul.mubr.bf16.gmra.mrb[28].mxu0 %v209_v13  ;;  %v32_v13 = vld [vmem:[%s3062_s0 + $0x18] sm:$0xff] }
  0x7a   :  { %620 = vmatprep.mubr.bf16.mxu0 %v214_v14  ;;  %v36_v14 = vld [vmem:[%s3062_s0 + $0x38] sm:$0xff] }
  0x7b   :  { %v184_v16 = vpack.c.bf16 %v36_v14, %v32_v13  ;;  %v103_v14 = vld [vmem:[%s3062_s0 + $0x250] sm:$0xff] }
  0x81   :  { %621 = vmatmul.mubr.bf16.gmra.mrb[32].mxu0 %v213_v19  ;;  %v40_v19 = vld [vmem:[%s3062_s0 + $0x58] sm:$0xff] }
  0x82   :  { %628 = vmatprep.mubr.bf16.mxu0 %v218_v20  ;;  %v44_v20 = vld [vmem:[%s3062_s0 + $0x78] sm:$0xff] }
  0x83   :  { %v188_v22 = vpack.c.bf16 %v44_v20, %v40_v19  ;;  %v111_v20 = vld [vmem:[%s3062_s0 + $0x290] sm:$0xff] }
  0x89   :  { %629 = vmatmul.mubr.bf16.gmra.mrb[36].mxu0 %v217_v25  ;;  %v48_v25 = vld [vmem:[%s3062_s0 + $0x98] sm:$0xff] }
  0x8a   :  { %636 = vmatprep.mubr.bf16.mxu0 %v222_v26  ;;  %v52_v26 = vld [vmem:[%s3062_s0 + $0xb8] sm:$0xff] }
  0x8b   :  { %v192_v28 = vpack.c.bf16 %v52_v26, %v48_v25  ;;  %v119_v26 = vld [vmem:[%s3062_s0 + $0x2d0] sm:$0xff] }
  0x91   :  { %637 = vmatmul.mubr.bf16.gmra.mrb[40].mxu0 %v221_v31  ;;  %v56_v31 = vld [vmem:[%s3062_s0 + $0xd8] sm:$0xff] }
  0x92   :  { %644 = vmatprep.mubr.bf16.mxu0 %v226_v32  ;;  %v60_v32 = vld [vmem:[%s3062_s0 + $0xf8] sm:$0xff] }
  0x93   :  { %v196_v34 = vpack.c.bf16 %v60_v32, %v56_v31 }
  0x99   :  { %645 = vmatmul.mubr.bf16.gmra.mrb[44].mxu0 %v225_v37  ;;  %v64_v37 = vld [vmem:[%s3062_s0 + $0x118] sm:$0xff] }
  0x9a   :  { %652 = vmatprep.mubr.bf16.mxu0 %v230_v38  ;;  %v2023_v38 = vmov 0.0  }
  0x9b   :  { %1680 = vmatprep.subr.bf16.mxu1 %v2023_v38  ;;  %1696 = vmatprep.mubr.msk.bf16.mxu1 %vm2024_vm2, %v2023_v38 }
  0x9c   :  { %1681 = vmatpush3.bf16.msra.mxu1 %v2006_v39 }
  0x9d   :  { %1682 = vmatprep.subr.bf16.mxu1 %v2023_v38 }
  0xa0   :  { %1683 = vmatpush3.bf16.msra.mxu1 %v2007_v41  ;;  %v135_v41 = vld [vmem:[%s3062_s0 + $0x350] sm:$0xff] }
  0xa1   :  { %653 = vmatmul.mubr.bf16.gmra.mrb[48].mxu0 %v229_v43  ;;  %v200_v43 = vpack.c.bf16 %v68_v40, %v64_v37  ;;  %1684 = vmatprep.subr.bf16.mxu1 %v2023_v38  ;;  %v140_v37 = vld [vmem:[%s3062_s0 + $0x378] sm:$0xff] }
  0xa2   :  { %660 = vmatprep.mubr.bf16.mxu0 %v234_v44  ;;  %v2008_v44 = vld [vmem:[%s3063_s3 + $0x10] sm:$0xff]   ;;  %v236_v40 = vpack.c.bf16 %v140_v37, %v136_v36  ;;  %v2017_v36 = vld [vmem:[%s3064_s5 + $0x18] sm:$0xff]  }
  0xa4   :  { %1685 = vmatpush3.bf16.msra.mxu1 %v2008_v44  ;;  %v148_v44 = vld [vmem:[%s3062_s0 + $0x3b8] sm:$0xff] }
  0xa5   :  { %1686 = vmatprep.subr.bf16.mxu1 %v2023_v38 }
  0xa9   :  { %661 = vmatmul.mubr.bf16.gmra.mrb[52].mxu0 %v233_v49  ;;  %v2009_v49 = vld [vmem:[%s3063_s3 + $0x18] sm:$0xff]  }
  0xaa   :  { %668 = vmatprep.mubr.bf16.mxu0 %v238_v50  ;;  %v199_v50 = vpack.c.bf16 %v67_v46, %v63_v45  ;;  %1687 = vmatpush3.bf16.msra.mxu1 %v2009_v49  ;;  %v152_v49 = vld [vmem:[%s3062_s0 + $0x3d8] sm:$0xff] }
  0xab   :  { %1688 = vmatprep.subr.bf16.mxu1 %v2023_v38 }
  0xae   :  { %1689 = vmatpush3.bf16.msra.mxu1 %v2010_v52 }
  0xaf   :  { %1690 = vmatprep.subr.bf16.mxu1 %v2023_v38 }
  0xb1   :  { %669 = vmatmul.mubr.bf16.gmra.mrb[56].mxu0 %v237_v55  ;;  %v80_v55 = vld [vmem:[%s3062_s0 + $0x198] sm:$0xff] }
  0xb2   :  { %676 = vmatprep.mubr.bf16.mxu0 %v242_v56  ;;  %v84_v56 = vld [vmem:[%s3062_s0 + $0x1b8] sm:$0xff]  ;;  %1691 = vmatpush3.bf16.msra.mxu1 %v2011_v57  ;;  %v243_v57 = vpack.c.bf16 %v155_v54, %v151_v53  ;;  %v2020_v54 = vld [vmem:[%s3064_s5 + $0x30] sm:$0xff]  }
  0xb3   :  { %v208_v59 = vpack.c.bf16 %v84_v56, %v80_v55  ;;  %1692 = vmatprep.subr.bf16.mxu1 %v2023_v38  ;;  %v160_v55 = vld [vmem:[%s3062_s0 + $0x418] sm:$0xff] }
  0xb4   :  { %v164_v56 = vld [vmem:[%s3062_s0 + $0x438] sm:$0xff] }
  0xb6   :  { %1693 = vmatpush3.bf16.msra.mxu1 %v2012_v30  ;;  %v2016_v30 = vld [vmem:[%s3064_s5 + $0x10] sm:$0xff]  }
  0xb7   :  { %1694 = vmatprep.subr.bf16.mxu1 %v2023_v38 }
  0xb9   :  { %677 = vmatmul.mubr.bf16.gmra.mrb[60].mxu0 %v241_v61  ;;  %v83_v61 = vld [vmem:[%s3062_s0 + $0x1b0] sm:$0xff] }
  0xba   :  { %684 = vmatprep.mubr.bf16.mxu0 %v246_v62  ;;  %v88_v62 = vld [vmem:[%s3062_s0 + $0x1d8] sm:$0xff]  ;;  %v207_v1 = vpack.c.bf16 %v83_v61, %v79_v60  ;;  %v163_v60 = vld [vmem:[%s3062_s0 + $0x430] sm:$0xff] }
  0xbb   :  { %v212_v0 = vpack.c.bf16 %v92_v63, %v88_v62  ;;  %v168_v61 = vld [vmem:[%s3062_s0 + $0x458] sm:$0xff] }
  0xbc   :  { %v172_v62 = vld [vmem:[%s3062_s0 + $0x478] sm:$0xff] }
  0xc1   :  { %685 = vmatmul.mubr.bf16.gmra.mrb[64].mxu0 %v245_v3  ;;  %v91_v3 = vld [vmem:[%s3062_s0 + $0x1f0] sm:$0xff] }
  0xc2   :  { %692 = vmatprep.mubr.bf16.mxu0 %v250_v4  ;;  %v96_v4 = vld [vmem:[%s3062_s0 + $0x218] sm:$0xff]  ;;  %v211_v6 = vpack.c.bf16 %v91_v3, %v87_v2  ;;  %v171_v2 = vld [vmem:[%s3062_s0 + $0x470] sm:$0xff] }
  0xc3   :  { %v216_v7 = vpack.c.bf16 %v100_v5, %v96_v4  ;;  %v176_v3 = vld [vmem:[%s3062_s0 + $0x498] sm:$0xff] }
  0xc4   :  { %v180_v4 = vld [vmem:[%s3062_s0 + $0x4b8] sm:$0xf] }
  0xc9   :  { %693 = vmatmul.mubr.bf16.gmra.mrb[68].mxu0 %v249_v9  ;;  %v99_v9 = vld [vmem:[%s3062_s0 + $0x230] sm:$0xff] }
  0xca   :  { %700 = vmatprep.mubr.bf16.mxu0 %v254_v10  ;;  %v104_v10 = vld [vmem:[%s3062_s0 + $0x258] sm:$0xff]  ;;  %v215_v12 = vpack.c.bf16 %v99_v9, %v95_v8  ;;  %v179_v8 = vld [vmem:[%s3062_s0 + $0x4b0] sm:$0xf] }
  0xcb   :  { %v220_v13 = vpack.c.bf16 %v108_v11, %v104_v10  ;;  %v2679_v10 = vld [vmem:[%s3065_s2] ss:$0 sm:$0xff] }
  0xd1   :  { %701 = vmatmul.mubr.bf16.gmra.mrb[72].mxu0 %v253_v15  ;;  %v107_v15 = vld [vmem:[%s3062_s0 + $0x270] sm:$0xff] }
  0xd2   :  { %1589 = vmatprep.mubr.msk.bf16.mxu0 %vm460_vm1, %v184_v16  ;;  %v112_v16 = vld [vmem:[%s3062_s0 + $0x298] sm:$0xff]  ;;  %v219_v18 = vpack.c.bf16 %v107_v15, %v103_v14 }
  0xd3   :  { %v224_v19 = vpack.c.bf16 %v116_v17, %v112_v16 }
  0xd9   :  { %742 = vmatmul.mubr.bf16.vlgmr.msra.gmra.mrb[0].mxu0 %v183_v21  ;;  %v115_v21 = vld [vmem:[%s3062_s0 + $0x2b0] sm:$0xff] }
  0xda   :  { %1590 = vmatprep.mubr.msk.bf16.mxu0 %vm460_vm1, %v188_v22  ;;  %v120_v22 = vld [vmem:[%s3062_s0 + $0x2d8] sm:$0xff]  ;;  %v223_v24 = vpack.c.bf16 %v115_v21, %v111_v20 }
  0xdb   :  { %v228_v25 = vpack.c.bf16 %v124_v23, %v120_v22 }
  0xe1   :  { %750 = vmatmul.mubr.bf16.gmra.mrb[4].mxu0 %v187_v27  ;;  %v123_v27 = vld [vmem:[%s3062_s0 + $0x2f0] sm:$0xff] }
  0xe2   :  { %1591 = vmatprep.mubr.msk.bf16.mxu0 %vm460_vm1, %v192_v28  ;;  %v128_v28 = vld [vmem:[%s3062_s0 + $0x318] sm:$0xff]  ;;  %v227_v31 = vpack.c.bf16 %v123_v27, %v119_v26 }
  0xe3   :  { %v232_v32 = vpack.c.bf16 %v132_v29, %v128_v28 }
  0xe9   :  { %758 = vmatmul.mubr.bf16.gmra.mrb[8].mxu0 %v191_v33  ;;  %v2013_v33 = vld [vmem:[%s3063_s3 + $0x38] sm:$0xff]  }
  0xea   :  { %1592 = vmatprep.mubr.msk.bf16.mxu0 %vm460_vm1, %v196_v34  ;;  %v127_v34 = vld [vmem:[%s3062_s0 + $0x310] sm:$0xff]  ;;  %1695 = vmatpush3.bf16.msra.mxu1 %v2013_v33 }
  0xeb   :  { %1772 = vmatprep.subr.bf16.mxu1 %v2023_v38  ;;  %v231_v39 = vpack.c.bf16 %v131_v35, %v127_v34 }
  0xf1   :  { %766 = vmatmul.mubr.bf16.gmra.mrb[12].mxu0 %v195_v42  ;;  %v139_v42 = vld [vmem:[%s3062_s0 + $0x370] sm:$0xff] }
  0xf2   :  { %1593 = vmatprep.mubr.msk.bf16.mxu0 %vm460_vm1, %v200_v43  ;;  %v144_v43 = vld [vmem:[%s3062_s0 + $0x398] sm:$0xff]  ;;  %v235_v45 = vpack.c.bf16 %v139_v42, %v135_v41 }
  0xf3   :  { %v240_v46 = vpack.c.bf16 %v148_v44, %v144_v43 }
  0xf9   :  { %774 = vmatmul.mubr.bf16.gmra.mrb[16].mxu0 %v199_v50  ;;  %v156_v50 = vld [vmem:[%s3062_s0 + $0x3f8] sm:$0xff] }
  0xfa   :  { %1594 = vmatprep.mubr.msk.bf16.mxu0 %vm460_vm1, %v204_v51  ;;  %v239_v51 = vpack.c.bf16 %v147_v48, %v143_v47  ;;  %v244_v52 = vpack.c.bf16 %v156_v50, %v152_v49  ;;  %v2019_v50 = vld [vmem:[%s3064_s5 + $0x28] sm:$0xff]  }
 0x101   :  { %782 = vmatmul.mubr.bf16.gmra.mrb[20].mxu0 %v203_v58  ;;  %v248_v58 = vpack.c.bf16 %v164_v56, %v160_v55 }
 0x102   :  { %1595 = vmatprep.mubr.msk.bf16.mxu0 %vm460_vm1, %v208_v59  ;;  %v159_v59 = vld [vmem:[%s3062_s0 + $0x410] sm:$0xff] }
 0x103   :  { %v247_v63 = vpack.c.bf16 %v163_v60, %v159_v59 }
 0x109   :  { %790 = vmatmul.mubr.bf16.gmra.mrb[24].mxu0 %v207_v1  ;;  %v252_v1 = vpack.c.bf16 %v172_v62, %v168_v61  ;;  %v2021_v61 = vld [vmem:[%s3064_s5 + $0x38] sm:$0xff]  }
 0x10a   :  { %1596 = vmatprep.mubr.msk.bf16.mxu0 %vm460_vm1, %v212_v0  ;;  %v167_v0 = vld [vmem:[%s3062_s0 + $0x450] sm:$0xff] }
 0x10b   :  { %v251_v5 = vpack.c.bf16 %v171_v2, %v167_v0 }
 0x111   :  { %798 = vmatmul.mubr.bf16.gmra.mrb[28].mxu0 %v211_v6  ;;  %v256_v6 = vpack.c.bf16 %v180_v4, %v176_v3 }
 0x112   :  { %1597 = vmatprep.mubr.msk.bf16.mxu0 %vm460_vm1, %v216_v7  ;;  %v175_v7 = vld [vmem:[%s3062_s0 + $0x490] sm:$0xff] }
 0x113   :  { %v255_v9 = vpack.c.bf16 %v179_v8, %v175_v7 }
 0x119   :  { %806 = vmatmul.mubr.bf16.gmra.mrb[32].mxu0 %v215_v12 }
 0x11a   :  { %1598 = vmatprep.mubr.msk.bf16.mxu0 %vm460_vm1, %v220_v13 }
 0x121   :  { %814 = vmatmul.mubr.bf16.gmra.mrb[36].mxu0 %v219_v18 }
 0x122   :  { %1599 = vmatprep.mubr.msk.bf16.mxu0 %vm460_vm1, %v224_v19  ;;  %v2014_v19 = vld [vmem:[%s3064_s5] sm:$0xff]  }
 0x129   :  { %822 = vmatmul.mubr.bf16.gmra.mrb[40].mxu0 %v223_v24 }
 0x12a   :  { %1600 = vmatprep.mubr.msk.bf16.mxu0 %vm460_vm1, %v228_v25  ;;  %v2015_v25 = vld [vmem:[%s3064_s5 + $0x8] sm:$0xff]  }
 0x131   :  { %830 = vmatmul.mubr.bf16.gmra.mrb[44].mxu0 %v227_v31 }
 0x132   :  { %1601 = vmatprep.mubr.msk.bf16.mxu0 %vm460_vm1, %v232_v32 }
 0x139   :  { %838 = vmatmul.mubr.bf16.gmra.mrb[48].mxu0 %v231_v39 }
 0x13a   :  { %1602 = vmatprep.mubr.msk.bf16.mxu0 %vm460_vm1, %v236_v40 }
 0x141   :  { %846 = vmatmul.mubr.bf16.gmra.mrb[52].mxu0 %v235_v45 }
 0x142   :  { %1603 = vmatprep.mubr.msk.bf16.mxu0 %vm460_vm1, %v240_v46  ;;  %v2018_v46 = vld [vmem:[%s3064_s5 + $0x20] sm:$0xff]  }
 0x149   :  { %854 = vmatmul.mubr.bf16.gmra.mrb[56].mxu0 %v239_v51 }
 0x14a   :  { %1604 = vmatprep.mubr.msk.bf16.mxu0 %vm460_vm1, %v244_v52 }
 0x151   :  { %862 = vmatmul.mubr.bf16.gmra.mrb[60].mxu0 %v243_v57 }
 0x152   :  { %1605 = vmatprep.mubr.msk.bf16.mxu0 %vm460_vm1, %v248_v58 }
 0x159   :  { %870 = vmatmul.mubr.bf16.gmra.mrb[64].mxu0 %v247_v63 }
 0x15a   :  { %1606 = vmatprep.mubr.msk.bf16.mxu0 %vm460_vm1, %v252_v1 }
 0x161   :  { %878 = vmatmul.mubr.bf16.gmra.mrb[68].mxu0 %v251_v5 }
 0x162   :  { %1607 = vmatprep.mubr.msk.bf16.mxu0 %vm460_vm1, %v256_v6 }
 0x169   :  { %886 = vmatmul.mubr.bf16.gmra.mrb[72].mxu0 %v255_v9 }
 0x1ac   :  { %v743_v11 = vpop.f32.mrb[0].mxu0 }
 0x1ad   :  { %v1864_v12 = vadd.f32 %v2679_v10, %v743_v11  ;;  %v745_v13 = vpop.f32.mrb[1].mxu0 }
 0x1ae   :  { %v746_v14 = vpop.f32.mrb[2].mxu0 }
 0x1af   :  { %v1865_v15 = vadd.f32 %v2679_v10, %v746_v14  ;;  %v748_v16 = vpop.f32.mrb[3].mxu0  ;;  %v894_v17 = vmax.f32 %v1864_v12, 0.0 }
 0x1b1   :  { %v895_v18 = vmax.f32 %v1865_v15, 0.0 }
 0x1b3   :  { %v932_v20 = vpack.c.bf16 %v895_v18, %v894_v17 }
 0x1b4   :  { %v751_v21 = vpop.f32.mrb[4].mxu0 }
 0x1b5   :  { %v1866_v22 = vadd.f32 %v2679_v10, %v751_v21  ;;  %v753_v23 = vpop.f32.mrb[5].mxu0  ;;  %1697 = vmatmul.mubr.bf16.vlgmr.msra.gmra.mrb[0].mxu1 %v932_v20 }
 0x1b6   :  { %v754_v24 = vpop.f32.mrb[6].mxu0  ;;  %1700 = vmatprep.mubr.msk.bf16.mxu1 %vm2024_vm2, %v2023_v38  ;;  %1773 = vmatpush3.bf16.msra.mxu1 %v2014_v19 }
 0x1b7   :  { %v1867_v26 = vadd.f32 %v2679_v10, %v754_v24  ;;  %v756_v27 = vpop.f32.mrb[7].mxu0  ;;  %1774 = vmatprep.subr.bf16.mxu1 %v2023_v38  ;;  %v896_v28 = vmax.f32 %v1866_v22, 0.0 }
 0x1b9   :  { %v897_v29 = vmax.f32 %v1867_v26, 0.0 }
 0x1ba   :  { %1775 = vmatpush3.bf16.msra.mxu1 %v2015_v25 }
 0x1bb   :  { %v933_v31 = vpack.c.bf16 %v897_v29, %v896_v28  ;;  %1776 = vmatprep.subr.bf16.mxu1 %v2023_v38 }
 0x1bc   :  { %v759_v32 = vpop.f32.mrb[8].mxu0 }
 0x1bd   :  { %v1868_v33 = vadd.f32 %v2679_v10, %v759_v32  ;;  %v761_v34 = vpop.f32.mrb[9].mxu0  ;;  %1701 = vmatmul.mubr.bf16.gmra.mrb[4].mxu1 %v933_v31 }
 0x1be   :  { %v762_v35 = vpop.f32.mrb[10].mxu0  ;;  %1704 = vmatprep.mubr.msk.bf16.mxu1 %vm2024_vm2, %v2023_v38  ;;  %1777 = vmatpush3.bf16.msra.mxu1 %v2016_v30 }
 0x1bf   :  { %v1869_v37 = vadd.f32 %v2679_v10, %v762_v35  ;;  %v764_v39 = vpop.f32.mrb[11].mxu0  ;;  %1778 = vmatprep.subr.bf16.mxu1 %v2023_v38  ;;  %v898_v40 = vmax.f32 %v1868_v33, 0.0 }
 0x1c1   :  { %v899_v41 = vmax.f32 %v1869_v37, 0.0 }
 0x1c2   :  { %1779 = vmatpush3.bf16.msra.mxu1 %v2017_v36 }
 0x1c3   :  { %v934_v42 = vpack.c.bf16 %v899_v41, %v898_v40  ;;  %1780 = vmatprep.subr.bf16.mxu1 %v2023_v38 }
 0x1c4   :  { %v767_v43 = vpop.f32.mrb[12].mxu0 }
 0x1c5   :  { %v1870_v44 = vadd.f32 %v2679_v10, %v767_v43  ;;  %v769_v45 = vpop.f32.mrb[13].mxu0  ;;  %1705 = vmatmul.mubr.bf16.gmra.mrb[8].mxu1 %v934_v42 }
 0x1c6   :  { %v770_v47 = vpop.f32.mrb[14].mxu0  ;;  %1708 = vmatprep.mubr.msk.bf16.mxu1 %vm2024_vm2, %v2023_v38  ;;  %1781 = vmatpush3.bf16.msra.mxu1 %v2018_v46 }
 0x1c7   :  { %v1871_v48 = vadd.f32 %v2679_v10, %v770_v47  ;;  %v772_v49 = vpop.f32.mrb[15].mxu0  ;;  %1782 = vmatprep.subr.bf16.mxu1 %v2023_v38  ;;  %v900_v51 = vmax.f32 %v1870_v44, 0.0 }
 0x1c9   :  { %v901_v52 = vmax.f32 %v1871_v48, 0.0 }
 0x1ca   :  { %1783 = vmatpush3.bf16.msra.mxu1 %v2019_v50 }
 0x1cb   :  { %v935_v53 = vpack.c.bf16 %v901_v52, %v900_v51  ;;  %1784 = vmatprep.subr.bf16.mxu1 %v2023_v38 }
 0x1cc   :  { %v775_v55 = vpop.f32.mrb[16].mxu0 }
 0x1cd   :  { %v1872_v56 = vadd.f32 %v2679_v10, %v775_v55  ;;  %v777_v57 = vpop.f32.mrb[17].mxu0  ;;  %1709 = vmatmul.mubr.bf16.gmra.mrb[12].mxu1 %v935_v53 }
 0x1ce   :  { %v778_v58 = vpop.f32.mrb[18].mxu0  ;;  %1712 = vmatprep.mubr.msk.bf16.mxu1 %vm2024_vm2, %v2023_v38  ;;  %1785 = vmatpush3.bf16.msra.mxu1 %v2020_v54 }
 0x1cf   :  { %v1873_v59 = vadd.f32 %v2679_v10, %v778_v58  ;;  %v780_v60 = vpop.f32.mrb[19].mxu0  ;;  %1786 = vmatprep.subr.bf16.mxu1 %v2023_v38  ;;  %v902_v62 = vmax.f32 %v1872_v56, 0.0 }
 0x1d1   :  { %v903_v63 = vmax.f32 %v1873_v59, 0.0 }
 0x1d2   :  { %1787 = vmatpush3.bf16.msra.mxu1 %v2021_v61 }
 0x1d3   :  { %v936_v1 = vpack.c.bf16 %v903_v63, %v902_v62 }
 0x1d4   :  { %v783_v0 = vpop.f32.mrb[20].mxu0 }
 0x1d5   :  { %v1874_v2 = vadd.f32 %v2679_v10, %v783_v0  ;;  %v785_v3 = vpop.f32.mrb[21].mxu0  ;;  %1713 = vmatmul.mubr.bf16.gmra.mrb[16].mxu1 %v936_v1 }
 0x1d6   :  { %v786_v4 = vpop.f32.mrb[22].mxu0  ;;  %1716 = vmatprep.mubr.msk.bf16.mxu1 %vm2024_vm2, %v2023_v38 }
 0x1d7   :  { %v1875_v5 = vadd.f32 %v2679_v10, %v786_v4  ;;  %v788_v6 = vpop.f32.mrb[23].mxu0  ;;  %v904_v7 = vmax.f32 %v1874_v2, 0.0 }
 0x1d9   :  { %v905_v8 = vmax.f32 %v1875_v5, 0.0 }
 0x1db   :  { %v937_v9 = vpack.c.bf16 %v905_v8, %v904_v7 }
 0x1dc   :  { %v791_v11 = vpop.f32.mrb[24].mxu0 }
 0x1dd   :  { %v1876_v12 = vadd.f32 %v2679_v10, %v791_v11  ;;  %v793_v13 = vpop.f32.mrb[25].mxu0  ;;  %1717 = vmatmul.mubr.bf16.gmra.mrb[20].mxu1 %v937_v9 }
 0x1de   :  { %v794_v14 = vpop.f32.mrb[26].mxu0  ;;  %1720 = vmatprep.mubr.msk.bf16.mxu1 %vm2024_vm2, %v2023_v38 }
 0x1df   :  { %v1877_v15 = vadd.f32 %v2679_v10, %v794_v14  ;;  %v796_v16 = vpop.f32.mrb[27].mxu0  ;;  %v906_v17 = vmax.f32 %v1876_v12, 0.0 }
 0x1e1   :  { %v907_v18 = vmax.f32 %v1877_v15, 0.0 }
 0x1e3   :  { %v938_v19 = vpack.c.bf16 %v907_v18, %v906_v17 }
 0x1e4   :  { %v799_v20 = vpop.f32.mrb[28].mxu0 }
 0x1e5   :  { %v1878_v21 = vadd.f32 %v2679_v10, %v799_v20  ;;  %v801_v22 = vpop.f32.mrb[29].mxu0  ;;  %1721 = vmatmul.mubr.bf16.gmra.mrb[24].mxu1 %v938_v19 }
 0x1e6   :  { %v802_v23 = vpop.f32.mrb[30].mxu0  ;;  %1724 = vmatprep.mubr.msk.bf16.mxu1 %vm2024_vm2, %v2023_v38 }
 0x1e7   :  { %v1879_v24 = vadd.f32 %v2679_v10, %v802_v23  ;;  %v804_v25 = vpop.f32.mrb[31].mxu0  ;;  %v908_v26 = vmax.f32 %v1878_v21, 0.0 }
 0x1e9   :  { %v909_v27 = vmax.f32 %v1879_v24, 0.0 }
 0x1eb   :  { %v939_v28 = vpack.c.bf16 %v909_v27, %v908_v26 }
 0x1ec   :  { %v807_v29 = vpop.f32.mrb[32].mxu0 }
 0x1ed   :  { %v1880_v30 = vadd.f32 %v2679_v10, %v807_v29  ;;  %v809_v31 = vpop.f32.mrb[33].mxu0  ;;  %1725 = vmatmul.mubr.bf16.gmra.mrb[28].mxu1 %v939_v28 }
 0x1ee   :  { %v810_v32 = vpop.f32.mrb[34].mxu0  ;;  %1728 = vmatprep.mubr.msk.bf16.mxu1 %vm2024_vm2, %v2023_v38 }
 0x1ef   :  { %v1881_v33 = vadd.f32 %v2679_v10, %v810_v32  ;;  %v812_v34 = vpop.f32.mrb[35].mxu0  ;;  %v910_v35 = vmax.f32 %v1880_v30, 0.0 }
 0x1f1   :  { %v911_v36 = vmax.f32 %v1881_v33, 0.0 }
 0x1f3   :  { %v940_v37 = vpack.c.bf16 %v911_v36, %v910_v35 }
 0x1f4   :  { %v815_v39 = vpop.f32.mrb[36].mxu0 }
 0x1f5   :  { %v1882_v40 = vadd.f32 %v2679_v10, %v815_v39  ;;  %v817_v41 = vpop.f32.mrb[37].mxu0  ;;  %1729 = vmatmul.mubr.bf16.gmra.mrb[32].mxu1 %v940_v37 }
 0x1f6   :  { %v818_v42 = vpop.f32.mrb[38].mxu0  ;;  %1732 = vmatprep.mubr.msk.bf16.mxu1 %vm2024_vm2, %v2023_v38 }
 0x1f7   :  { %v1883_v43 = vadd.f32 %v2679_v10, %v818_v42  ;;  %v820_v44 = vpop.f32.mrb[39].mxu0  ;;  %v912_v45 = vmax.f32 %v1882_v40, 0.0 }
 0x1f9   :  { %v913_v46 = vmax.f32 %v1883_v43, 0.0 }
 0x1fb   :  { %v941_v47 = vpack.c.bf16 %v913_v46, %v912_v45 }
 0x1fc   :  { %v823_v48 = vpop.f32.mrb[40].mxu0 }
 0x1fd   :  { %v1884_v49 = vadd.f32 %v2679_v10, %v823_v48  ;;  %v825_v50 = vpop.f32.mrb[41].mxu0  ;;  %1733 = vmatmul.mubr.bf16.gmra.mrb[36].mxu1 %v941_v47 }
 0x1fe   :  { %v826_v51 = vpop.f32.mrb[42].mxu0  ;;  %1736 = vmatprep.mubr.msk.bf16.mxu1 %vm2024_vm2, %v2023_v38 }
 0x1ff   :  { %v1885_v52 = vadd.f32 %v2679_v10, %v826_v51  ;;  %v828_v53 = vpop.f32.mrb[43].mxu0  ;;  %v914_v54 = vmax.f32 %v1884_v49, 0.0 }
 0x201   :  { %v915_v55 = vmax.f32 %v1885_v52, 0.0 }
 0x203   :  { %v942_v56 = vpack.c.bf16 %v915_v55, %v914_v54 }
 0x204   :  { %v831_v57 = vpop.f32.mrb[44].mxu0 }
 0x205   :  { %v1886_v58 = vadd.f32 %v2679_v10, %v831_v57  ;;  %v833_v59 = vpop.f32.mrb[45].mxu0  ;;  %1737 = vmatmul.mubr.bf16.gmra.mrb[40].mxu1 %v942_v56 }
 0x206   :  { %v834_v60 = vpop.f32.mrb[46].mxu0  ;;  %1740 = vmatprep.mubr.msk.bf16.mxu1 %vm2024_vm2, %v2023_v38 }
 0x207   :  { %v1887_v61 = vadd.f32 %v2679_v10, %v834_v60  ;;  %v836_v62 = vpop.f32.mrb[47].mxu0  ;;  %v916_v63 = vmax.f32 %v1886_v58, 0.0 }
 0x209   :  { %v917_v1 = vmax.f32 %v1887_v61, 0.0 }
 0x20b   :  { %v943_v0 = vpack.c.bf16 %v917_v1, %v916_v63 }
 0x20c   :  { %v839_v2 = vpop.f32.mrb[48].mxu0 }
 0x20d   :  { %v1888_v3 = vadd.f32 %v2679_v10, %v839_v2  ;;  %v841_v4 = vpop.f32.mrb[49].mxu0  ;;  %1741 = vmatmul.mubr.bf16.gmra.mrb[44].mxu1 %v943_v0 }
 0x20e   :  { %v842_v5 = vpop.f32.mrb[50].mxu0  ;;  %1744 = vmatprep.mubr.msk.bf16.mxu1 %vm2024_vm2, %v2023_v38 }
 0x20f   :  { %v1889_v6 = vadd.f32 %v2679_v10, %v842_v5  ;;  %v844_v7 = vpop.f32.mrb[51].mxu0  ;;  %v918_v8 = vmax.f32 %v1888_v3, 0.0  ;;  %v2791_v3 = vld [vmem:[%s3066_s4] ss:$0 sm:$0xff] }
 0x211   :  { %v919_v9 = vmax.f32 %v1889_v6, 0.0 }
 0x213   :  { %v944_v11 = vpack.c.bf16 %v919_v9, %v918_v8 }
 0x214   :  { %v847_v12 = vpop.f32.mrb[52].mxu0 }
 0x215   :  { %v1890_v13 = vadd.f32 %v2679_v10, %v847_v12  ;;  %v849_v14 = vpop.f32.mrb[53].mxu0  ;;  %1745 = vmatmul.mubr.bf16.gmra.mrb[48].mxu1 %v944_v11 }
 0x216   :  { %v850_v15 = vpop.f32.mrb[54].mxu0  ;;  %1748 = vmatprep.mubr.msk.bf16.mxu1 %vm2024_vm2, %v2023_v38 }
 0x217   :  { %v1891_v16 = vadd.f32 %v2679_v10, %v850_v15  ;;  %v852_v17 = vpop.f32.mrb[55].mxu0  ;;  %v920_v18 = vmax.f32 %v1890_v13, 0.0 }
 0x219   :  { %v921_v19 = vmax.f32 %v1891_v16, 0.0 }
 0x21b   :  { %v945_v20 = vpack.c.bf16 %v921_v19, %v920_v18 }
 0x21c   :  { %v855_v21 = vpop.f32.mrb[56].mxu0 }
 0x21d   :  { %v1892_v22 = vadd.f32 %v2679_v10, %v855_v21  ;;  %v857_v23 = vpop.f32.mrb[57].mxu0  ;;  %1749 = vmatmul.mubr.bf16.gmra.mrb[52].mxu1 %v945_v20 }
 0x21e   :  { %v858_v24 = vpop.f32.mrb[58].mxu0  ;;  %1752 = vmatprep.mubr.msk.bf16.mxu1 %vm2024_vm2, %v2023_v38 }
 0x21f   :  { %v1893_v25 = vadd.f32 %v2679_v10, %v858_v24  ;;  %v860_v26 = vpop.f32.mrb[59].mxu0  ;;  %v922_v27 = vmax.f32 %v1892_v22, 0.0 }
 0x221   :  { %v923_v28 = vmax.f32 %v1893_v25, 0.0 }
 0x223   :  { %v946_v29 = vpack.c.bf16 %v923_v28, %v922_v27 }
 0x224   :  { %v863_v30 = vpop.f32.mrb[60].mxu0 }
 0x225   :  { %v1894_v31 = vadd.f32 %v2679_v10, %v863_v30  ;;  %v865_v32 = vpop.f32.mrb[61].mxu0  ;;  %1753 = vmatmul.mubr.bf16.gmra.mrb[56].mxu1 %v946_v29 }
 0x226   :  { %v866_v33 = vpop.f32.mrb[62].mxu0  ;;  %1756 = vmatprep.mubr.msk.bf16.mxu1 %vm2024_vm2, %v2023_v38 }
 0x227   :  { %v1895_v34 = vadd.f32 %v2679_v10, %v866_v33  ;;  %v868_v35 = vpop.f32.mrb[63].mxu0  ;;  %v924_v36 = vmax.f32 %v1894_v31, 0.0 }
 0x228   :  { %v12_v35 = vstv %s3067_s6 }
 0x229   :  { %v925_v37 = vmax.f32 %v1895_v34, 0.0  ;;  %13 = vst [vmem:[#allocation2] sm:$0x1] %v12_v35 }
 0x22b   :  { %v947_v39 = vpack.c.bf16 %v925_v37, %v924_v36 }
 0x22c   :  { %v871_v40 = vpop.f32.mrb[64].mxu0 }
 0x22d   :  { %v1896_v41 = vadd.f32 %v2679_v10, %v871_v40  ;;  %v873_v42 = vpop.f32.mrb[65].mxu0  ;;  %1757 = vmatmul.mubr.bf16.gmra.mrb[60].mxu1 %v947_v39 }
 0x22e   :  { %v874_v43 = vpop.f32.mrb[66].mxu0  ;;  %1760 = vmatprep.mubr.msk.bf16.mxu1 %vm2024_vm2, %v2023_v38 }
 0x22f   :  { %v1897_v44 = vadd.f32 %v2679_v10, %v874_v43  ;;  %v876_v45 = vpop.f32.mrb[67].mxu0  ;;  %v926_v46 = vmax.f32 %v1896_v41, 0.0 }
 0x231   :  { %v927_v47 = vmax.f32 %v1897_v44, 0.0 }
 0x233   :  { %v948_v48 = vpack.c.bf16 %v927_v47, %v926_v46 }
 0x234   :  { %v879_v49 = vpop.f32.mrb[68].mxu0 }
 0x235   :  { %v1898_v50 = vadd.f32 %v2679_v10, %v879_v49  ;;  %v881_v51 = vpop.f32.mrb[69].mxu0  ;;  %1761 = vmatmul.mubr.bf16.gmra.mrb[64].mxu1 %v948_v48 }
 0x236   :  { %v882_v52 = vpop.f32.mrb[70].mxu0  ;;  %1764 = vmatprep.mubr.msk.bf16.mxu1 %vm2024_vm2, %v2023_v38 }
 0x237   :  { %v1899_v53 = vadd.f32 %v2679_v10, %v882_v52  ;;  %v884_v54 = vpop.f32.mrb[71].mxu0  ;;  %v928_v55 = vmax.f32 %v1898_v50, 0.0 }
 0x239   :  { %v929_v56 = vmax.f32 %v1899_v53, 0.0 }
 0x23b   :  { %v949_v57 = vpack.c.bf16 %v929_v56, %v928_v55 }
 0x23c   :  { %v887_v58 = vpop.f32.mrb[72].mxu0 }
 0x23d   :  { %v1900_v59 = vadd.f32 %v2679_v10, %v887_v58  ;;  %v889_v60 = vpop.f32.mrb[73].mxu0  ;;  %1765 = vmatmul.mubr.bf16.gmra.mrb[68].mxu1 %v949_v57 }
 0x23e   :  { %v890_v61 = vpop.f32.mrb[74].mxu0  ;;  %1768 = vmatprep.mubr.msk.bf16.mxu1 %vm2024_vm2, %v2023_v38 }
 0x23f   :  { %v1901_v62 = vadd.f32 %v2679_v10, %v890_v61  ;;  %v892_v63 = vpop.f32.mrb[75].mxu0  ;;  %v930_v1 = vmax.f32 %v1900_v59, 0.0 }
 0x241   :  { %v931_v0 = vmax.f32 %v1901_v62, 0.0 }
 0x243   :  { %v950_v2 = vpack.c.bf16 %v931_v0, %v930_v1 }
 0x245   :  { %1769 = vmatmul.mubr.bf16.gmra.mrb[72].mxu1 %v950_v2 }
 0x246   :  { %1788 = vmatprep.mubr.msk.bf16.mxu1 %vm2024_vm2, %v2023_v38 }
 0x288   :  { %v1056_v4 = vpop.f32.mrb[0].mxu1 }
 0x289   :  { %v1057_v5 = vadd.f32 %v2791_v3, %v1056_v4  ;;  %v1698_v6 = vpop.f32.mrb[1].mxu1 }
 0x28a   :  { %v1059_v7 = vpop.f32.mrb[2].mxu1 }
 0x28b   :  { %v1060_v10 = vadd.f32 %v2791_v3, %v1059_v7  ;;  %v1699_v8 = vpop.f32.mrb[3].mxu1  ;;  %v1207_v9 = vmax.f32 %v1057_v5, 0.0 }
 0x28d   :  { %v1208_v11 = vmax.f32 %v1060_v10, 0.0 }
 0x28f   :  { %v1245_v12 = vpack.c.bf16 %v1208_v11, %v1207_v9 }
 0x290   :  { %v1064_v13 = vpop.f32.mrb[4].mxu1 }
 0x291   :  { %v1065_v14 = vadd.f32 %v2791_v3, %v1064_v13  ;;  %v1702_v15 = vpop.f32.mrb[5].mxu1  ;;  %1789 = vmatmul.mubr.bf16.vlgmr.msra.gmra.mrb[76].mxu1 %v1245_v12 }
 0x292   :  { %v1067_v16 = vpop.f32.mrb[6].mxu1  ;;  %1792 = vmatprep.mubr.msk.bf16.mxu1 %vm2024_vm2, %v2023_v38 }
 0x293   :  { %v1068_v17 = vadd.f32 %v2791_v3, %v1067_v16  ;;  %v1703_v18 = vpop.f32.mrb[7].mxu1  ;;  %v1209_v19 = vmax.f32 %v1065_v14, 0.0 }
 0x295   :  { %v1210_v20 = vmax.f32 %v1068_v17, 0.0 }
 0x297   :  { %v1246_v21 = vpack.c.bf16 %v1210_v20, %v1209_v19 }
 0x298   :  { %v1072_v22 = vpop.f32.mrb[8].mxu1 }
 0x299   :  { %v1073_v23 = vadd.f32 %v2791_v3, %v1072_v22  ;;  %v1706_v24 = vpop.f32.mrb[9].mxu1  ;;  %1793 = vmatmul.mubr.bf16.gmra.mrb[80].mxu1 %v1246_v21 }
 0x29a   :  { %v1075_v25 = vpop.f32.mrb[10].mxu1  ;;  %1796 = vmatprep.mubr.msk.bf16.mxu1 %vm2024_vm2, %v2023_v38 }
 0x29b   :  { %v1076_v26 = vadd.f32 %v2791_v3, %v1075_v25  ;;  %v1707_v27 = vpop.f32.mrb[11].mxu1  ;;  %v1211_v28 = vmax.f32 %v1073_v23, 0.0 }
 0x29d   :  { %v1212_v29 = vmax.f32 %v1076_v26, 0.0 }
 0x29f   :  { %v1247_v30 = vpack.c.bf16 %v1212_v29, %v1211_v28 }
 0x2a0   :  { %v1080_v31 = vpop.f32.mrb[12].mxu1 }
 0x2a1   :  { %v1081_v32 = vadd.f32 %v2791_v3, %v1080_v31  ;;  %v1710_v33 = vpop.f32.mrb[13].mxu1  ;;  %1797 = vmatmul.mubr.bf16.gmra.mrb[84].mxu1 %v1247_v30 }
 0x2a2   :  { %v1083_v34 = vpop.f32.mrb[14].mxu1  ;;  %1800 = vmatprep.mubr.msk.bf16.mxu1 %vm2024_vm2, %v2023_v38 }
 0x2a3   :  { %v1084_v36 = vadd.f32 %v2791_v3, %v1083_v34  ;;  %v1711_v37 = vpop.f32.mrb[15].mxu1  ;;  %v1213_v39 = vmax.f32 %v1081_v32, 0.0 }
 0x2a5   :  { %v1214_v40 = vmax.f32 %v1084_v36, 0.0 }
 0x2a7   :  { %v1248_v41 = vpack.c.bf16 %v1214_v40, %v1213_v39 }
 0x2a8   :  { %v1088_v42 = vpop.f32.mrb[16].mxu1 }
 0x2a9   :  { %v1089_v43 = vadd.f32 %v2791_v3, %v1088_v42  ;;  %v1714_v44 = vpop.f32.mrb[17].mxu1  ;;  %1801 = vmatmul.mubr.bf16.gmra.mrb[88].mxu1 %v1248_v41 }
 0x2aa   :  { %v1091_v45 = vpop.f32.mrb[18].mxu1  ;;  %1804 = vmatprep.mubr.msk.bf16.mxu1 %vm2024_vm2, %v2023_v38 }
 0x2ab   :  { %v1092_v46 = vadd.f32 %v2791_v3, %v1091_v45  ;;  %v1715_v47 = vpop.f32.mrb[19].mxu1  ;;  %v1215_v48 = vmax.f32 %v1089_v43, 0.0 }
 0x2ad   :  { %v1216_v49 = vmax.f32 %v1092_v46, 0.0 }
 0x2af   :  { %v1249_v50 = vpack.c.bf16 %v1216_v49, %v1215_v48 }
 0x2b0   :  { %v1096_v51 = vpop.f32.mrb[20].mxu1 }
 0x2b1   :  { %v1097_v52 = vadd.f32 %v2791_v3, %v1096_v51  ;;  %v1718_v53 = vpop.f32.mrb[21].mxu1  ;;  %1805 = vmatmul.mubr.bf16.gmra.mrb[92].mxu1 %v1249_v50 }
 0x2b2   :  { %v1099_v54 = vpop.f32.mrb[22].mxu1  ;;  %1808 = vmatprep.mubr.msk.bf16.mxu1 %vm2024_vm2, %v2023_v38 }
 0x2b3   :  { %v1100_v55 = vadd.f32 %v2791_v3, %v1099_v54  ;;  %v1719_v56 = vpop.f32.mrb[23].mxu1  ;;  %v1217_v57 = vmax.f32 %v1097_v52, 0.0 }
 0x2b5   :  { %v1218_v58 = vmax.f32 %v1100_v55, 0.0 }
 0x2b7   :  { %v1250_v59 = vpack.c.bf16 %v1218_v58, %v1217_v57 }
 0x2b8   :  { %v1104_v60 = vpop.f32.mrb[24].mxu1 }
 0x2b9   :  { %v1105_v61 = vadd.f32 %v2791_v3, %v1104_v60  ;;  %v1722_v62 = vpop.f32.mrb[25].mxu1  ;;  %1809 = vmatmul.mubr.bf16.gmra.mrb[96].mxu1 %v1250_v59 }
 0x2ba   :  { %v1107_v63 = vpop.f32.mrb[26].mxu1  ;;  %1812 = vmatprep.mubr.msk.bf16.mxu1 %vm2024_vm2, %v2023_v38 }
 0x2bb   :  { %v1108_v1 = vadd.f32 %v2791_v3, %v1107_v63  ;;  %v1723_v0 = vpop.f32.mrb[27].mxu1  ;;  %v1219_v2 = vmax.f32 %v1105_v61, 0.0 }
 0x2bd   :  { %v1220_v4 = vmax.f32 %v1108_v1, 0.0 }
 0x2bf   :  { %v1251_v5 = vpack.c.bf16 %v1220_v4, %v1219_v2 }
 0x2c0   :  { %v1112_v6 = vpop.f32.mrb[28].mxu1 }
 0x2c1   :  { %v1113_v7 = vadd.f32 %v2791_v3, %v1112_v6  ;;  %v1726_v10 = vpop.f32.mrb[29].mxu1  ;;  %1813 = vmatmul.mubr.bf16.gmra.mrb[100].mxu1 %v1251_v5 }
 0x2c2   :  { %v1115_v8 = vpop.f32.mrb[30].mxu1  ;;  %1816 = vmatprep.mubr.msk.bf16.mxu1 %vm2024_vm2, %v2023_v38 }
 0x2c3   :  { %v1116_v9 = vadd.f32 %v2791_v3, %v1115_v8  ;;  %v1727_v11 = vpop.f32.mrb[31].mxu1  ;;  %v1221_v12 = vmax.f32 %v1113_v7, 0.0 }
 0x2c5   :  { %v1222_v13 = vmax.f32 %v1116_v9, 0.0 }
 0x2c7   :  { %v1252_v14 = vpack.c.bf16 %v1222_v13, %v1221_v12 }
 0x2c8   :  { %v1120_v15 = vpop.f32.mrb[32].mxu1 }
 0x2c9   :  { %v1121_v16 = vadd.f32 %v2791_v3, %v1120_v15  ;;  %v1730_v17 = vpop.f32.mrb[33].mxu1  ;;  %1817 = vmatmul.mubr.bf16.gmra.mrb[104].mxu1 %v1252_v14 }
 0x2ca   :  { %v1123_v18 = vpop.f32.mrb[34].mxu1  ;;  %1820 = vmatprep.mubr.msk.bf16.mxu1 %vm2024_vm2, %v2023_v38 }
 0x2cb   :  { %v1124_v19 = vadd.f32 %v2791_v3, %v1123_v18  ;;  %v1731_v20 = vpop.f32.mrb[35].mxu1  ;;  %v1223_v21 = vmax.f32 %v1121_v16, 0.0 }
 0x2cd   :  { %v1224_v22 = vmax.f32 %v1124_v19, 0.0 }
 0x2cf   :  { %v1253_v23 = vpack.c.bf16 %v1224_v22, %v1223_v21 }
 0x2d0   :  { %v1128_v24 = vpop.f32.mrb[36].mxu1 }
 0x2d1   :  { %v1129_v25 = vadd.f32 %v2791_v3, %v1128_v24  ;;  %v1734_v26 = vpop.f32.mrb[37].mxu1  ;;  %1821 = vmatmul.mubr.bf16.gmra.mrb[108].mxu1 %v1253_v23 }
 0x2d2   :  { %v1131_v27 = vpop.f32.mrb[38].mxu1  ;;  %1824 = vmatprep.mubr.msk.bf16.mxu1 %vm2024_vm2, %v2023_v38 }
 0x2d3   :  { %v1132_v28 = vadd.f32 %v2791_v3, %v1131_v27  ;;  %v1735_v29 = vpop.f32.mrb[39].mxu1  ;;  %v1225_v30 = vmax.f32 %v1129_v25, 0.0 }
 0x2d5   :  { %v1226_v31 = vmax.f32 %v1132_v28, 0.0 }
 0x2d7   :  { %v1254_v32 = vpack.c.bf16 %v1226_v31, %v1225_v30 }
 0x2d8   :  { %v1136_v33 = vpop.f32.mrb[40].mxu1 }
 0x2d9   :  { %v1137_v34 = vadd.f32 %v2791_v3, %v1136_v33  ;;  %v1738_v35 = vpop.f32.mrb[41].mxu1  ;;  %1825 = vmatmul.mubr.bf16.gmra.mrb[112].mxu1 %v1254_v32 }
 0x2da   :  { %v1139_v36 = vpop.f32.mrb[42].mxu1  ;;  %1828 = vmatprep.mubr.msk.bf16.mxu1 %vm2024_vm2, %v2023_v38 }
 0x2db   :  { %v1140_v37 = vadd.f32 %v2791_v3, %v1139_v36  ;;  %v1739_v39 = vpop.f32.mrb[43].mxu1  ;;  %v1227_v40 = vmax.f32 %v1137_v34, 0.0 }
 0x2dd   :  { %v1228_v41 = vmax.f32 %v1140_v37, 0.0 }
 0x2df   :  { %v1255_v42 = vpack.c.bf16 %v1228_v41, %v1227_v40 }
 0x2e0   :  { %v1144_v43 = vpop.f32.mrb[44].mxu1 }
 0x2e1   :  { %v1145_v44 = vadd.f32 %v2791_v3, %v1144_v43  ;;  %v1742_v45 = vpop.f32.mrb[45].mxu1  ;;  %1829 = vmatmul.mubr.bf16.gmra.mrb[116].mxu1 %v1255_v42 }
 0x2e2   :  { %v1147_v46 = vpop.f32.mrb[46].mxu1  ;;  %1832 = vmatprep.mubr.msk.bf16.mxu1 %vm2024_vm2, %v2023_v38 }
 0x2e3   :  { %v1148_v47 = vadd.f32 %v2791_v3, %v1147_v46  ;;  %v1743_v48 = vpop.f32.mrb[47].mxu1  ;;  %v1229_v49 = vmax.f32 %v1145_v44, 0.0 }
 0x2e5   :  { %v1230_v50 = vmax.f32 %v1148_v47, 0.0 }
 0x2e7   :  { %v1256_v51 = vpack.c.bf16 %v1230_v50, %v1229_v49 }
 0x2e8   :  { %v1152_v52 = vpop.f32.mrb[48].mxu1 }
 0x2e9   :  { %v1153_v53 = vadd.f32 %v2791_v3, %v1152_v52  ;;  %v1746_v54 = vpop.f32.mrb[49].mxu1  ;;  %1833 = vmatmul.mubr.bf16.gmra.mrb[120].mxu1 %v1256_v51 }
 0x2ea   :  { %v1155_v55 = vpop.f32.mrb[50].mxu1  ;;  %1836 = vmatprep.mubr.msk.bf16.mxu1 %vm2024_vm2, %v2023_v38 }
 0x2eb   :  { %v1156_v56 = vadd.f32 %v2791_v3, %v1155_v55  ;;  %v1747_v57 = vpop.f32.mrb[51].mxu1  ;;  %v1231_v58 = vmax.f32 %v1153_v53, 0.0  ;;  %v2870_v53 = vld [vmem:[#allocation2] ss:$0 sm:$0xff] }
 0x2ed   :  { %v1232_v59 = vmax.f32 %v1156_v56, 0.0 }
 0x2ef   :  { %v1257_v60 = vpack.c.bf16 %v1232_v59, %v1231_v58 }
 0x2f0   :  { %v1160_v61 = vpop.f32.mrb[52].mxu1 }
 0x2f1   :  { %v1161_v62 = vadd.f32 %v2791_v3, %v1160_v61  ;;  %v1750_v63 = vpop.f32.mrb[53].mxu1  ;;  %1837 = vmatmul.mubr.bf16.gmra.mrb[124].mxu1 %v1257_v60 }
 0x2f2   :  { %v1163_v1 = vpop.f32.mrb[54].mxu1  ;;  %1840 = vmatprep.mubr.msk.bf16.mxu1 %vm2024_vm2, %v2023_v38 }
 0x2f3   :  { %v1164_v0 = vadd.f32 %v2791_v3, %v1163_v1  ;;  %v1751_v2 = vpop.f32.mrb[55].mxu1  ;;  %v1233_v4 = vmax.f32 %v1161_v62, 0.0 }
 0x2f5   :  { %v1234_v5 = vmax.f32 %v1164_v0, 0.0 }
 0x2f7   :  { %v1258_v6 = vpack.c.bf16 %v1234_v5, %v1233_v4 }
 0x2f8   :  { %v1168_v7 = vpop.f32.mrb[56].mxu1 }
 0x2f9   :  { %v1169_v10 = vadd.f32 %v2791_v3, %v1168_v7  ;;  %v1754_v8 = vpop.f32.mrb[57].mxu1  ;;  %1841 = vmatmul.mubr.bf16.gmra.mrb[128].mxu1 %v1258_v6 }
 0x2fa   :  { %v1171_v9 = vpop.f32.mrb[58].mxu1  ;;  %1844 = vmatprep.mubr.msk.bf16.mxu1 %vm2024_vm2, %v2023_v38 }
 0x2fb   :  { %v1172_v11 = vadd.f32 %v2791_v3, %v1171_v9  ;;  %v1755_v12 = vpop.f32.mrb[59].mxu1  ;;  %v1235_v13 = vmax.f32 %v1169_v10, 0.0 }
 0x2fd   :  { %v1236_v14 = vmax.f32 %v1172_v11, 0.0 }
 0x2ff   :  { %v1259_v15 = vpack.c.bf16 %v1236_v14, %v1235_v13 }
 0x300   :  { %v1176_v16 = vpop.f32.mrb[60].mxu1 }
 0x301   :  { %v1177_v17 = vadd.f32 %v2791_v3, %v1176_v16  ;;  %v1758_v18 = vpop.f32.mrb[61].mxu1  ;;  %1845 = vmatmul.mubr.bf16.gmra.mrb[132].mxu1 %v1259_v15 }
 0x302   :  { %v1179_v19 = vpop.f32.mrb[62].mxu1  ;;  %1848 = vmatprep.mubr.msk.bf16.mxu1 %vm2024_vm2, %v2023_v38 }
 0x303   :  { %v1180_v20 = vadd.f32 %v2791_v3, %v1179_v19  ;;  %v1759_v21 = vpop.f32.mrb[63].mxu1  ;;  %v1237_v22 = vmax.f32 %v1177_v17, 0.0 }
 0x305   :  { %v1238_v23 = vmax.f32 %v1180_v20, 0.0 }
 0x307   :  { %v1260_v24 = vpack.c.bf16 %v1238_v23, %v1237_v22 }
 0x308   :  { %v1184_v25 = vpop.f32.mrb[64].mxu1 }
 0x309   :  { %v1185_v26 = vadd.f32 %v2791_v3, %v1184_v25  ;;  %v1762_v27 = vpop.f32.mrb[65].mxu1  ;;  %1849 = vmatmul.mubr.bf16.gmra.mrb[136].mxu1 %v1260_v24 }
 0x30a   :  { %v1187_v28 = vpop.f32.mrb[66].mxu1  ;;  %1852 = vmatprep.mubr.msk.bf16.mxu1 %vm2024_vm2, %v2023_v38 }
 0x30b   :  { %v1188_v29 = vadd.f32 %v2791_v3, %v1187_v28  ;;  %v1763_v30 = vpop.f32.mrb[67].mxu1  ;;  %v1239_v31 = vmax.f32 %v1185_v26, 0.0 }
 0x30d   :  { %v1240_v32 = vmax.f32 %v1188_v29, 0.0 }
 0x30f   :  { %v1261_v33 = vpack.c.bf16 %v1240_v32, %v1239_v31 }
 0x310   :  { %v1192_v34 = vpop.f32.mrb[68].mxu1 }
 0x311   :  { %v1193_v35 = vadd.f32 %v2791_v3, %v1192_v34  ;;  %v1766_v36 = vpop.f32.mrb[69].mxu1  ;;  %1853 = vmatmul.mubr.bf16.gmra.mrb[140].mxu1 %v1261_v33 }
 0x312   :  { %v1195_v37 = vpop.f32.mrb[70].mxu1  ;;  %1856 = vmatprep.mubr.msk.bf16.mxu1 %vm2024_vm2, %v2023_v38 }
 0x313   :  { %v1196_v39 = vadd.f32 %v2791_v3, %v1195_v37  ;;  %v1767_v40 = vpop.f32.mrb[71].mxu1  ;;  %v1241_v41 = vmax.f32 %v1193_v35, 0.0 }
 0x315   :  { %v1242_v42 = vmax.f32 %v1196_v39, 0.0 }
 0x317   :  { %v1262_v43 = vpack.c.bf16 %v1242_v42, %v1241_v41 }
 0x318   :  { %v1200_v44 = vpop.f32.mrb[72].mxu1 }
 0x319   :  { %v1201_v45 = vadd.f32 %v2791_v3, %v1200_v44  ;;  %v1770_v46 = vpop.f32.mrb[73].mxu1  ;;  %1857 = vmatmul.mubr.bf16.gmra.mrb[144].mxu1 %v1262_v43 }
 0x31a   :  { %v1203_v47 = vpop.f32.mrb[74].mxu1  ;;  %1860 = vmatprep.mubr.msk.bf16.mxu1 %vm2024_vm2, %v2023_v38 }
 0x31b   :  { %v1204_v48 = vadd.f32 %v2791_v3, %v1203_v47  ;;  %v1771_v49 = vpop.f32.mrb[75].mxu1  ;;  %v1243_v50 = vmax.f32 %v1201_v45, 0.0 }
 0x31d   :  { %v1244_v51 = vmax.f32 %v1204_v48, 0.0 }
 0x31f   :  { %v1263_v52 = vpack.c.bf16 %v1244_v51, %v1243_v50 }
 0x321   :  { %1861 = vmatmul.mubr.bf16.gmra.mrb[148].mxu1 %v1263_v52 }
 0x364   :  { %v1369_v54 = vpop.f32.mrb[76].mxu1 }
 0x365   :  { %v1370_v55 = vadd.f32 %v2870_v53, %v1369_v54  ;;  %v1790_v56 = vpop.f32.mrb[77].mxu1 }
 0x366   :  { %v1372_v57 = vpop.f32.mrb[78].mxu1 }
 0x367   :  { %1520 = vst.msk [vmem:[%s3068_s7] sm:$0xff] %vm460_vm1, %v1370_v55  ;;  %v1373_v38 = vadd.f32 %v2870_v53, %v1372_v57  ;;  %v1791_v3 = vpop.f32.mrb[79].mxu1 }
 0x369   :  { %1521 = vst.msk [vmem:[%s3068_s7 + $0x8] sm:$0xff] %vm460_vm1, %v1373_v38 }
 0x36c   :  { %v1377_v58 = vpop.f32.mrb[80].mxu1 }
 0x36d   :  { %v1378_v59 = vadd.f32 %v2870_v53, %v1377_v58  ;;  %v1794_v60 = vpop.f32.mrb[81].mxu1 }
 0x36e   :  { %v1380_v61 = vpop.f32.mrb[82].mxu1 }
 0x36f   :  { %1522 = vst.msk [vmem:[%s3068_s7 + $0x10] sm:$0xff] %vm460_vm1, %v1378_v59  ;;  %v1381_v62 = vadd.f32 %v2870_v53, %v1380_v61  ;;  %v1795_v63 = vpop.f32.mrb[83].mxu1 }
 0x371   :  { %1523 = vst.msk [vmem:[%s3068_s7 + $0x18] sm:$0xff] %vm460_vm1, %v1381_v62 }
 0x374   :  { %v1385_v1 = vpop.f32.mrb[84].mxu1 }
 0x375   :  { %v1386_v0 = vadd.f32 %v2870_v53, %v1385_v1  ;;  %v1798_v2 = vpop.f32.mrb[85].mxu1 }
 0x376   :  { %v1388_v4 = vpop.f32.mrb[86].mxu1 }
 0x377   :  { %1524 = vst.msk [vmem:[%s3068_s7 + $0x20] sm:$0xff] %vm460_vm1, %v1386_v0  ;;  %v1389_v5 = vadd.f32 %v2870_v53, %v1388_v4  ;;  %v1799_v6 = vpop.f32.mrb[87].mxu1 }
 0x379   :  { %1525 = vst.msk [vmem:[%s3068_s7 + $0x28] sm:$0xff] %vm460_vm1, %v1389_v5 }
 0x37c   :  { %v1393_v7 = vpop.f32.mrb[88].mxu1 }
 0x37d   :  { %v1394_v10 = vadd.f32 %v2870_v53, %v1393_v7  ;;  %v1802_v8 = vpop.f32.mrb[89].mxu1 }
 0x37e   :  { %v1396_v9 = vpop.f32.mrb[90].mxu1 }
 0x37f   :  { %1526 = vst.msk [vmem:[%s3068_s7 + $0x30] sm:$0xff] %vm460_vm1, %v1394_v10  ;;  %v1397_v11 = vadd.f32 %v2870_v53, %v1396_v9  ;;  %v1803_v12 = vpop.f32.mrb[91].mxu1 }
 0x381   :  { %1527 = vst.msk [vmem:[%s3068_s7 + $0x38] sm:$0xff] %vm460_vm1, %v1397_v11 }
 0x384   :  { %v1401_v13 = vpop.f32.mrb[92].mxu1 }
 0x385   :  { %v1402_v14 = vadd.f32 %v2870_v53, %v1401_v13  ;;  %v1806_v15 = vpop.f32.mrb[93].mxu1 }
 0x386   :  { %v1404_v16 = vpop.f32.mrb[94].mxu1 }
 0x387   :  { %1528 = vst.msk [vmem:[%s3068_s7 + $0x40] sm:$0xff] %vm460_vm1, %v1402_v14  ;;  %v1405_v17 = vadd.f32 %v2870_v53, %v1404_v16  ;;  %v1807_v18 = vpop.f32.mrb[95].mxu1 }
 0x389   :  { %1529 = vst.msk [vmem:[%s3068_s7 + $0x48] sm:$0xff] %vm460_vm1, %v1405_v17 }
 0x38c   :  { %v1409_v19 = vpop.f32.mrb[96].mxu1 }
 0x38d   :  { %v1410_v20 = vadd.f32 %v2870_v53, %v1409_v19  ;;  %v1810_v21 = vpop.f32.mrb[97].mxu1 }
 0x38e   :  { %v1412_v22 = vpop.f32.mrb[98].mxu1 }
 0x38f   :  { %1530 = vst.msk [vmem:[%s3068_s7 + $0x50] sm:$0xff] %vm460_vm1, %v1410_v20  ;;  %v1413_v23 = vadd.f32 %v2870_v53, %v1412_v22  ;;  %v1811_v24 = vpop.f32.mrb[99].mxu1 }
 0x391   :  { %1531 = vst.msk [vmem:[%s3068_s7 + $0x58] sm:$0xff] %vm460_vm1, %v1413_v23 }
 0x394   :  { %v1417_v25 = vpop.f32.mrb[100].mxu1 }
 0x395   :  { %v1418_v26 = vadd.f32 %v2870_v53, %v1417_v25  ;;  %v1814_v27 = vpop.f32.mrb[101].mxu1 }
 0x396   :  { %v1420_v28 = vpop.f32.mrb[102].mxu1 }
 0x397   :  { %1532 = vst.msk [vmem:[%s3068_s7 + $0x60] sm:$0xff] %vm460_vm1, %v1418_v26  ;;  %v1421_v29 = vadd.f32 %v2870_v53, %v1420_v28  ;;  %v1815_v30 = vpop.f32.mrb[103].mxu1 }
 0x399   :  { %1533 = vst.msk [vmem:[%s3068_s7 + $0x68] sm:$0xff] %vm460_vm1, %v1421_v29 }
 0x39c   :  { %v1425_v31 = vpop.f32.mrb[104].mxu1 }
 0x39d   :  { %v1426_v32 = vadd.f32 %v2870_v53, %v1425_v31  ;;  %v1818_v33 = vpop.f32.mrb[105].mxu1 }
 0x39e   :  { %v1428_v34 = vpop.f32.mrb[106].mxu1 }
 0x39f   :  { %1534 = vst.msk [vmem:[%s3068_s7 + $0x70] sm:$0xff] %vm460_vm1, %v1426_v32  ;;  %v1429_v35 = vadd.f32 %v2870_v53, %v1428_v34  ;;  %v1819_v36 = vpop.f32.mrb[107].mxu1 }
 0x3a1   :  { %1535 = vst.msk [vmem:[%s3068_s7 + $0x78] sm:$0xff] %vm460_vm1, %v1429_v35 }
 0x3a4   :  { %v1433_v37 = vpop.f32.mrb[108].mxu1 }
 0x3a5   :  { %v1434_v39 = vadd.f32 %v2870_v53, %v1433_v37  ;;  %v1822_v40 = vpop.f32.mrb[109].mxu1 }
 0x3a6   :  { %v1436_v41 = vpop.f32.mrb[110].mxu1 }
 0x3a7   :  { %1536 = vst.msk [vmem:[%s3068_s7 + $0x80] sm:$0xff] %vm460_vm1, %v1434_v39  ;;  %v1437_v42 = vadd.f32 %v2870_v53, %v1436_v41  ;;  %v1823_v43 = vpop.f32.mrb[111].mxu1 }
 0x3a9   :  { %1537 = vst.msk [vmem:[%s3068_s7 + $0x88] sm:$0xff] %vm460_vm1, %v1437_v42 }
 0x3ac   :  { %v1441_v44 = vpop.f32.mrb[112].mxu1 }
 0x3ad   :  { %v1442_v45 = vadd.f32 %v2870_v53, %v1441_v44  ;;  %v1826_v46 = vpop.f32.mrb[113].mxu1 }
 0x3ae   :  { %v1444_v47 = vpop.f32.mrb[114].mxu1 }
 0x3af   :  { %1538 = vst.msk [vmem:[%s3068_s7 + $0x90] sm:$0xff] %vm460_vm1, %v1442_v45  ;;  %v1445_v48 = vadd.f32 %v2870_v53, %v1444_v47  ;;  %v1827_v49 = vpop.f32.mrb[115].mxu1 }
 0x3b1   :  { %1539 = vst.msk [vmem:[%s3068_s7 + $0x98] sm:$0xff] %vm460_vm1, %v1445_v48 }
 0x3b4   :  { %v1449_v50 = vpop.f32.mrb[116].mxu1 }
 0x3b5   :  { %v1450_v51 = vadd.f32 %v2870_v53, %v1449_v50  ;;  %v1830_v52 = vpop.f32.mrb[117].mxu1 }
 0x3b6   :  { %v1452_v54 = vpop.f32.mrb[118].mxu1 }
 0x3b7   :  { %1540 = vst.msk [vmem:[%s3068_s7 + $0xa0] sm:$0xff] %vm460_vm1, %v1450_v51  ;;  %v1453_v55 = vadd.f32 %v2870_v53, %v1452_v54  ;;  %v1831_v56 = vpop.f32.mrb[119].mxu1 }
 0x3b9   :  { %1541 = vst.msk [vmem:[%s3068_s7 + $0xa8] sm:$0xff] %vm460_vm1, %v1453_v55 }
 0x3bc   :  { %v1457_v57 = vpop.f32.mrb[120].mxu1 }
 0x3bd   :  { %v1458_v38 = vadd.f32 %v2870_v53, %v1457_v57  ;;  %v1834_v3 = vpop.f32.mrb[121].mxu1 }
 0x3be   :  { %v1460_v58 = vpop.f32.mrb[122].mxu1 }
 0x3bf   :  { %1542 = vst.msk [vmem:[%s3068_s7 + $0xb0] sm:$0xff] %vm460_vm1, %v1458_v38  ;;  %v1461_v59 = vadd.f32 %v2870_v53, %v1460_v58  ;;  %v1835_v60 = vpop.f32.mrb[123].mxu1 }
 0x3c1   :  { %1543 = vst.msk [vmem:[%s3068_s7 + $0xb8] sm:$0xff] %vm460_vm1, %v1461_v59 }
 0x3c4   :  { %v1465_v61 = vpop.f32.mrb[124].mxu1 }
 0x3c5   :  { %v1466_v62 = vadd.f32 %v2870_v53, %v1465_v61  ;;  %v1838_v63 = vpop.f32.mrb[125].mxu1 }
 0x3c6   :  { %v1468_v1 = vpop.f32.mrb[126].mxu1 }
 0x3c7   :  { %1544 = vst.msk [vmem:[%s3068_s7 + $0xc0] sm:$0xff] %vm460_vm1, %v1466_v62  ;;  %v1469_v0 = vadd.f32 %v2870_v53, %v1468_v1  ;;  %v1839_v2 = vpop.f32.mrb[127].mxu1 }
 0x3c9   :  { %1545 = vst.msk [vmem:[%s3068_s7 + $0xc8] sm:$0xff] %vm460_vm1, %v1469_v0 }
 0x3cc   :  { %v1473_v4 = vpop.f32.mrb[128].mxu1 }
 0x3cd   :  { %v1474_v5 = vadd.f32 %v2870_v53, %v1473_v4  ;;  %v1842_v6 = vpop.f32.mrb[129].mxu1 }
 0x3ce   :  { %v1476_v7 = vpop.f32.mrb[130].mxu1 }
 0x3cf   :  { %1546 = vst.msk [vmem:[%s3068_s7 + $0xd0] sm:$0xff] %vm460_vm1, %v1474_v5  ;;  %v1477_v10 = vadd.f32 %v2870_v53, %v1476_v7  ;;  %v1843_v8 = vpop.f32.mrb[131].mxu1 }
 0x3d1   :  { %1547 = vst.msk [vmem:[%s3068_s7 + $0xd8] sm:$0xff] %vm460_vm1, %v1477_v10 }
 0x3d4   :  { %v1481_v9 = vpop.f32.mrb[132].mxu1 }
 0x3d5   :  { %v1482_v11 = vadd.f32 %v2870_v53, %v1481_v9  ;;  %v1846_v12 = vpop.f32.mrb[133].mxu1 }
 0x3d6   :  { %v1484_v13 = vpop.f32.mrb[134].mxu1 }
 0x3d7   :  { %1548 = vst.msk [vmem:[%s3068_s7 + $0xe0] sm:$0xff] %vm460_vm1, %v1482_v11  ;;  %v1485_v14 = vadd.f32 %v2870_v53, %v1484_v13  ;;  %v1847_v15 = vpop.f32.mrb[135].mxu1 }
 0x3d9   :  { %1549 = vst.msk [vmem:[%s3068_s7 + $0xe8] sm:$0xff] %vm460_vm1, %v1485_v14 }
 0x3dc   :  { %v1489_v16 = vpop.f32.mrb[136].mxu1 }
 0x3dd   :  { %v1490_v17 = vadd.f32 %v2870_v53, %v1489_v16  ;;  %v1850_v18 = vpop.f32.mrb[137].mxu1 }
 0x3de   :  { %v1492_v19 = vpop.f32.mrb[138].mxu1 }
 0x3df   :  { %1550 = vst.msk [vmem:[%s3068_s7 + $0xf0] sm:$0xff] %vm460_vm1, %v1490_v17  ;;  %v1493_v20 = vadd.f32 %v2870_v53, %v1492_v19  ;;  %v1851_v21 = vpop.f32.mrb[139].mxu1 }
 0x3e1   :  { %1551 = vst.msk [vmem:[%s3068_s7 + $0xf8] sm:$0xff] %vm460_vm1, %v1493_v20 }
 0x3e4   :  { %v1497_v22 = vpop.f32.mrb[140].mxu1 }
 0x3e5   :  { %v1498_v23 = vadd.f32 %v2870_v53, %v1497_v22  ;;  %v1854_v24 = vpop.f32.mrb[141].mxu1 }
 0x3e6   :  { %v1500_v25 = vpop.f32.mrb[142].mxu1 }
 0x3e7   :  { %1552 = vst.msk [vmem:[%s3068_s7 + $0x100] sm:$0xff] %vm460_vm1, %v1498_v23  ;;  %v1501_v26 = vadd.f32 %v2870_v53, %v1500_v25  ;;  %v1855_v27 = vpop.f32.mrb[143].mxu1 }
 0x3e9   :  { %1553 = vst.msk [vmem:[%s3068_s7 + $0x108] sm:$0xff] %vm460_vm1, %v1501_v26 }
 0x3ec   :  { %v1505_v28 = vpop.f32.mrb[144].mxu1 }
 0x3ed   :  { %v1506_v29 = vadd.f32 %v2870_v53, %v1505_v28  ;;  %v1858_v30 = vpop.f32.mrb[145].mxu1 }
 0x3ee   :  { %v1508_v31 = vpop.f32.mrb[146].mxu1 }
 0x3ef   :  { %1554 = vst.msk [vmem:[%s3068_s7 + $0x110] sm:$0xff] %vm460_vm1, %v1506_v29  ;;  %v1509_v32 = vadd.f32 %v2870_v53, %v1508_v31  ;;  %v1859_v33 = vpop.f32.mrb[147].mxu1 }
 0x3f1   :  { %1555 = vst.msk [vmem:[%s3068_s7 + $0x118] sm:$0xff] %vm460_vm1, %v1509_v32 }
 0x3f4   :  { %v1513_v34 = vpop.f32.mrb[148].mxu1 }
 0x3f5   :  { %v1514_v35 = vadd.f32 %v2870_v53, %v1513_v34  ;;  %v1862_v36 = vpop.f32.mrb[149].mxu1 }
 0x3f6   :  { %v1516_v37 = vpop.f32.mrb[150].mxu1 }
 0x3f7   :  { %1556 = vst.msk [vmem:[%s3068_s7 + $0x120] sm:$0xff] %vm460_vm1, %v1514_v35  ;;  %v1517_v39 = vadd.f32 %v2870_v53, %v1516_v37  ;;  %v1863_v40 = vpop.f32.mrb[151].mxu1 }
 0x3f9   :  { %1558 = vst.msk [vmem:[%s3068_s7 + $0x128] sm:$0xf] %vm1557_vm3, %v1517_v39 }

</bundles_post_ra>
